<compile_context>
chip_gen: v5e
topology: v5e:2x2
jax: 0.10.0
libtpu: 0.0.40
codegen_flags: <defaults>
</compile_context>

<pallas_src>
import functools

import jax
import jax.numpy as jnp
import numpy as np
from jax.experimental import pallas as pl
from jax.experimental.pallas import tpu as pltpu

NEG_INF = -1e30  # stand-in for utils.NEG_INF
PAD_ID = 18
NEG_SAMPLE_ID = 0


def _round_up(x: int, m: int) -> int:
    return ((x + m - 1) // m) * m


def _pruner_kernel(sj_ref, si_ref, mask_ref, ms_ref, out_ref,
                   acc_ref, hi_ref, sel_ref, *, min_score):
    """One (batch-tile, j-tile, key-tile) grid step.

    sj_ref   : (tb, tj) f32   scores of the "query" spans (output columns)
    si_ref   : (tb, ti) f32   scores of the "key" spans (reduction axis)
    mask_ref : (tb, tj) i32   span (un)padding mask
    ms_ref   : (tb, 1)  i32   per-row max_spans cap
    out_ref  : (tb, tj) i32   selected-span mask
    acc_ref  : (tb, tj) f32   running descending-rank of each query span
    hi_ref   : (tb, 1)  f32   running count of scores >= min_score (nb_high)
    sel_ref  : (tb, tb*ti) bf16  block-diagonal ones (MXU row-reduce selector)
    """
    ji = pl.program_id(1)
    ki = pl.program_id(2)
    tb, tj = acc_ref.shape
    ti = si_ref.shape[1]

    @pl.when(ki == 0)
    def _init():
        acc_ref[...] = jnp.zeros_like(acc_ref)
        hi_ref[...] = jnp.zeros_like(hi_ref)
        # Block-diagonal selector sel[b, b*ti + i] = 1 used to do the key-axis
        # reduction as a single MXU matmul.  Built once per (batch, j)-tile.
        row = jax.lax.broadcasted_iota(jnp.int32, sel_ref.shape, 0)
        col = jax.lax.broadcasted_iota(jnp.int32, sel_ref.shape, 1)
        sel_ref[...] = ((col >= row * ti) & (col < (row + 1) * ti)).astype(sel_ref.dtype)

    s_j = sj_ref[...]                        # (tb, tj)
    s_i = si_ref[...]                        # (tb, ti)

    # nb_high_scores = sum(scores >= min_score) over the full row, accumulated
    # across key tiles.  Padded lanes hold NEG_INF and never count.
    hi_ref[...] += jnp.sum((s_i >= min_score).astype(jnp.float32),
                           axis=1, keepdims=True)

    # Pairwise comparison, transposed so the j (output) axis sits on lanes:
    #   cmp_t[b, i, j] = (s_i > s_j) | ((s_i == s_j) & (i_glob < j_glob))
    # Tie-break mask is a single (ti, tj) grid, broadcast over batch.
    i_glob = ki * ti + jax.lax.broadcasted_iota(jnp.int32, (ti, tj), 0)
    j_glob = ji * tj + jax.lax.broadcasted_iota(jnp.int32, (ti, tj), 1)
    tie_wins = i_glob < j_glob               # (ti, tj)

    si3 = s_i[:, :, None]                    # (tb, ti, 1)
    sj3 = s_j[:, None, :]                    # (tb, 1, tj)
    cmp_t = (si3 > sj3) | ((si3 == sj3) & tie_wins[None, :, :])   # (tb, ti, tj)

    # rank += sum_i cmp_t  — as one MXU matmul:
    #   (tb, tb*ti) block-diag ones @ (tb*ti, tj) -> (tb, tj)
    # 0/1 values in bf16 accumulate exactly in f32.
    cmp2 = cmp_t.astype(jnp.bfloat16).reshape(tb * ti, tj)
    acc_ref[...] += jnp.dot(sel_ref[...], cmp2, preferred_element_type=jnp.float32)

    @pl.when(ki == pl.num_programs(2) - 1)
    def _finalize():
        # k = max(min(max_spans, nb_high), 1), per row
        k = jnp.maximum(jnp.minimum(ms_ref[...].astype(jnp.float32), hi_ref[...]), 1.0)
        keep = acc_ref[...] < k              # rank < k -> top-k, ties to lower index
        out_ref[...] = (keep & (mask_ref[...] > 0)).astype(jnp.int32)


def pruner_forward(scores, span_mask, max_spans, *, min_score=None,
                   gold_labels=None, pad_id=PAD_ID, neg_sample_id=NEG_SAMPLE_ID,
                   tb=8, tn=128):
    """JAX wrapper mirroring Pruner.forward (scores-given / gold-labels paths)."""
    assert tb % 8 == 0 and tn % 128 == 0
    B, N = scores.shape
    scores = scores.astype(jnp.float32)
    span_mask = span_mask.astype(jnp.int32)

    if isinstance(max_spans, int):
        max_spans_vec = jnp.full((B,), max_spans, dtype=jnp.int32)
    else:
        max_spans_vec = jnp.broadcast_to(
            jnp.asarray(max_spans, dtype=jnp.int32).reshape(-1), (B,))

    if gold_labels is not None:
        cond = (gold_labels != pad_id) & (gold_labels != neg_sample_id)
        scores = jnp.where(cond, jnp.float32(0.0), jnp.float32(NEG_INF))
        max_spans_vec = jnp.sum(cond, axis=1).astype(jnp.int32)
        min_score = 0.0
    # TODO(synk): scores=None path requires running self.scorer(span_embs); not implemented.

    if min_score is None:
        # Reference code would fail here (nb_high_scores undefined).
        raise ValueError("min_score must be set when gold_labels is None")

    # Pad to tile-aligned shapes: scores -> NEG_INF (never counted by nb_high,
    # never outranks a real span), mask -> 0, max_spans -> 1 for padded rows.
    B_pad = _round_up(B, tb)
    N_pad = _round_up(N, tn)
    scores_p = jnp.full((B_pad, N_pad), NEG_INF, dtype=jnp.float32).at[:B, :N].set(scores)
    mask_p = jnp.zeros((B_pad, N_pad), dtype=jnp.int32).at[:B, :N].set(span_mask)
    ms_p = jnp.ones((B_pad, 1), dtype=jnp.int32).at[:B, 0].set(max_spans_vec)

    grid = (B_pad // tb, N_pad // tn, N_pad // tn)
    kernel = functools.partial(_pruner_kernel, min_score=float(min_score))

    out = pl.pallas_call(
        kernel,
        out_shape=jax.ShapeDtypeStruct((B_pad, N_pad), jnp.int32),
        grid_spec=pltpu.PrefetchScalarGridSpec(
            num_scalar_prefetch=0,
            grid=grid,
            in_specs=[
                pl.BlockSpec((tb, tn), lambda bi, ji, ki: (bi, ji)),  # scores (j)
                pl.BlockSpec((tb, tn), lambda bi, ji, ki: (bi, ki)),  # scores (i)
                pl.BlockSpec((tb, tn), lambda bi, ji, ki: (bi, ji)),  # span_mask
                pl.BlockSpec((tb, 1), lambda bi, ji, ki: (bi, 0)),    # max_spans
            ],
            out_specs=pl.BlockSpec((tb, tn), lambda bi, ji, ki: (bi, ji)),
            scratch_shapes=[
                pltpu.VMEM((tb, tn), jnp.float32),        # rank accumulator
                pltpu.VMEM((tb, 1), jnp.float32),         # nb_high accumulator
                pltpu.VMEM((tb, tb * tn), jnp.bfloat16),  # block-diag MXU selector
            ],
        ),
        compiler_params=pltpu.CompilerParams(
            dimension_semantics=("parallel", "parallel", "arbitrary"),
            vmem_limit_bytes=32 * 1024 * 1024,
        ),
    )(scores_p, scores_p, mask_p, ms_p)
    return out[:B, :N]


def _numpy_reference(scores, span_mask, max_spans, min_score):
    scores = np.asarray(scores, dtype=np.float64)
    span_mask = np.asarray(span_mask, dtype=np.int64)
    B, N = scores.shape
    max_spans = np.broadcast_to(np.asarray(max_spans, dtype=np.int64).reshape(-1), (B,))
    out = np.zeros((B, N), dtype=np.int64)
    for b in range(B):
        nb_high = int(np.sum(scores[b] >= min_score))
        k = max(min(int(max_spans[b]), nb_high), 1)
        order = np.argsort(-scores[b], kind="stable")  # ties -> lower index first
        out[b, order[:k]] = 1
    return out * span_mask


if __name__ == "__main__":
    key = jax.random.PRNGKey(0)
    k1, k2, k3, k4, k5 = jax.random.split(key, 5)

    # --- test 1: main path, single-tile shapes --------------------------------
    B, N = 2, 16
    logits = jax.random.normal(k1, (B, N), dtype=jnp.float32)
    scores = jax.nn.softmax(logits, axis=-1)
    span_mask = (jax.random.uniform(k2, (B, N)) > 0.25).astype(jnp.int32)
    max_spans, min_score = 5, 0.05

    out = jax.block_until_ready(
        pruner_forward(scores, span_mask, max_spans, min_score=min_score))
    ref = _numpy_reference(scores, span_mask, max_spans, min_score)
    assert np.array_equal(np.asarray(out), ref), "main path mismatch"

    # --- test 2: multi-tile grid, per-row max_spans, deliberate score ties ----
    B2, N2 = 3, 200
    logits2 = jax.random.normal(k3, (B2, N2), dtype=jnp.float32)
    scores2 = jax.nn.softmax(logits2, axis=-1)
    scores2 = scores2.at[:, 7].set(scores2[:, 150])   # exact ties across j/key tiles
    span_mask2 = (jax.random.uniform(k4, (B2, N2)) > 0.2).astype(jnp.int32)
    max_spans2 = jnp.array([3, 60, 250], dtype=jnp.int32)
    min_score2 = 0.004
    out2 = jax.block_until_ready(
        pruner_forward(scores2, span_mask2, max_spans2, min_score=min_score2))
    ref2 = _numpy_reference(scores2, span_mask2, max_spans2, min_score2)
    assert np.array_equal(np.asarray(out2), ref2), "multi-tile path mismatch"

    # --- test 3: gold-labels path, including an all-pad row (k=1 fallback) ----
    gold = jax.random.randint(k5, (B, N), 0, 20, dtype=jnp.int32)
    gold = gold.at[1, :].set(PAD_ID)                  # row with no gold spans
    out_g = jax.block_until_ready(
        pruner_forward(scores, span_mask, max_spans, gold_labels=gold))
    cond = (np.asarray(gold) != PAD_ID) & (np.asarray(gold) != NEG_SAMPLE_ID)
    g_scores = np.where(cond, 0.0, NEG_INF).astype(np.float32)
    g_max = cond.sum(axis=1)
    ref_g = _numpy_reference(g_scores, span_mask, g_max, 0.0)
    assert np.array_equal(np.asarray(out_g), ref_g), "gold path mismatch"

    print("KERNEL_OK")
</pallas_src>

<mosaic_0001>
module attributes {stable_mosaic.version = 11 : i64} {
  func.func @_pruner_kernel(%arg0: i32, %arg1: i32, %arg2: i32, %arg3: memref<8x128xf32, #tpu.memory_space<vmem>>, %arg4: memref<8x128xf32, #tpu.memory_space<vmem>>, %arg5: memref<8x128xi32, #tpu.memory_space<vmem>>, %arg6: memref<8x1xi32, #tpu.memory_space<vmem>>, %arg7: memref<8x128xi32, #tpu.memory_space<vmem>>, %arg8: memref<8x128xf32, #tpu.memory_space<vmem>>, %arg9: memref<8x1xf32, #tpu.memory_space<vmem>>, %arg10: memref<8x1024xbf16, #tpu.memory_space<vmem>>) attributes {dimension_semantics = [#tpu.dimension_semantics<parallel>, #tpu.dimension_semantics<parallel>, #tpu.dimension_semantics<arbitrary>], iteration_bounds = array<i64: 1, 1, 1>, scalar_prefetch = 0 : i64, scratch_operands = 3 : i64, tpu.core_type = #tpu.core_type<tc>, window_params = [{transform_indices = @transform_0, window_bounds = array<i64: 8, 128>}, {transform_indices = @transform_1, window_bounds = array<i64: 8, 128>}, {transform_indices = @transform_2, window_bounds = array<i64: 8, 128>}, {transform_indices = @transform_3, window_bounds = array<i64: 8, 1>}, {transform_indices = @transform_4, window_bounds = array<i64: 8, 128>}]} {
    %c0_i32 = arith.constant 0 : i32
    %0 = arith.cmpi eq, %arg2, %c0_i32 : i32
    %1 = arith.extui %0 : i1 to i32
    %c0_i32_0 = arith.constant 0 : i32
    %2 = arith.cmpi ne, %1, %c0_i32_0 : i32
    scf.if %2 {
      %cst_19 = arith.constant 0.000000e+00 : f32
      %47 = vector.broadcast %cst_19 : f32 to vector<8x128xf32>
      %c0_20 = arith.constant 0 : index
      %c0_21 = arith.constant 0 : index
      %48 = vector.load %arg8[%c0_20, %c0_21] : memref<8x128xf32, #tpu.memory_space<vmem>>, vector<8x128xf32>
      tpu.vector_store %arg8[%c0_20, %c0_21], %47 {strides = array<i32>} : memref<8x128xf32, #tpu.memory_space<vmem>>, vector<8x128xf32>,
      %cst_22 = arith.constant 0.000000e+00 : f32
      %49 = vector.broadcast %cst_22 : f32 to vector<8x1xf32>
      %c0_23 = arith.constant 0 : index
      %c0_24 = arith.constant 0 : index
      %50 = vector.load %arg9[%c0_23, %c0_24] : memref<8x1xf32, #tpu.memory_space<vmem>>, vector<8x1xf32>
      tpu.vector_store %arg9[%c0_23, %c0_24], %49 {strides = array<i32>} : memref<8x1xf32, #tpu.memory_space<vmem>>, vector<8x1xf32>,
      %51 = tpu.iota {dimensions = array<i32: 0>} : vector<8x1024xi32>
      %52 = tpu.iota {dimensions = array<i32: 1>} : vector<8x1024xi32>
      %c128_i32_25 = arith.constant 128 : i32
      %53 = vector.broadcast %c128_i32_25 : i32 to vector<8x1024xi32>
      %54 = arith.muli %51, %53 : vector<8x1024xi32>
      %55 = arith.cmpi sge, %52, %54 : vector<8x1024xi32>
      %c1_i32 = arith.constant 1 : i32
      %56 = vector.broadcast %c1_i32 : i32 to vector<8x1024xi32>
      %57 = arith.addi %51, %56 : vector<8x1024xi32>
      %c128_i32_26 = arith.constant 128 : i32
      %58 = vector.broadcast %c128_i32_26 : i32 to vector<8x1024xi32>
      %59 = arith.muli %57, %58 : vector<8x1024xi32>
      %60 = arith.cmpi slt, %52, %59 : vector<8x1024xi32>
      %61 = arith.andi %55, %60 : vector<8x1024xi1>
      %62 = arith.extui %61 : vector<8x1024xi1> to vector<8x1024xi32>
      %63 = arith.sitofp %62 : vector<8x1024xi32> to vector<8x1024xf32>
      %64 = arith.truncf %63 : vector<8x1024xf32> to vector<8x1024xbf16>
      %c0_27 = arith.constant 0 : index
      %c0_28 = arith.constant 0 : index
      %65 = vector.load %arg10[%c0_27, %c0_28] : memref<8x1024xbf16, #tpu.memory_space<vmem>>, vector<8x1024xbf16>
      tpu.vector_store %arg10[%c0_27, %c0_28], %64 {strides = array<i32>} : memref<8x1024xbf16, #tpu.memory_space<vmem>>, vector<8x1024xbf16>,
    } else {
    }
    %c0 = arith.constant 0 : index
    %c0_1 = arith.constant 0 : index
    %3 = vector.load %arg3[%c0, %c0_1] : memref<8x128xf32, #tpu.memory_space<vmem>>, vector<8x128xf32>
    %c0_2 = arith.constant 0 : index
    %c0_3 = arith.constant 0 : index
    %4 = vector.load %arg4[%c0_2, %c0_3] : memref<8x128xf32, #tpu.memory_space<vmem>>, vector<8x128xf32>
    %c0_4 = arith.constant 0 : index
    %c0_5 = arith.constant 0 : index
    %5 = vector.load %arg9[%c0_4, %c0_5] : memref<8x1xf32, #tpu.memory_space<vmem>>, vector<8x1xf32>
    %cst = arith.constant 5.000000e-02 : f32
    %6 = vector.broadcast %cst : f32 to vector<8x128xf32>
    %7 = arith.cmpf oge, %4, %6 : vector<8x128xf32>
    %8 = arith.extui %7 : vector<8x128xi1> to vector<8x128xi32>
    %9 = arith.sitofp %8 : vector<8x128xi32> to vector<8x128xf32>
    %cst_6 = arith.constant dense<0.000000e+00> : vector<8xf32>
    %10 = vector.multi_reduction <add>, %9, %cst_6 [1] : vector<8x128xf32> to vector<8xf32>
    %11 = vector.shape_cast %10 : vector<8xf32> to vector<8x1xf32>
    %12 = arith.addf %5, %11 : vector<8x1xf32>
    %c0_7 = arith.constant 0 : index
    %c0_8 = arith.constant 0 : index
    %13 = vector.load %arg9[%c0_7, %c0_8] : memref<8x1xf32, #tpu.memory_space<vmem>>, vector<8x1xf32>
    tpu.vector_store %arg9[%c0_7, %c0_8], %12 {strides = array<i32>} : memref<8x1xf32, #tpu.memory_space<vmem>>, vector<8x1xf32>,
    %c128_i32 = arith.constant 128 : i32
    %14 = arith.muli %arg2, %c128_i32 : i32
    %15 = tpu.iota {dimensions = array<i32: 0>} : vector<128x128xi32>
    %16 = vector.broadcast %14 : i32 to vector<128x128xi32>
    %17 = arith.addi %16, %15 : vector<128x128xi32>
    %c128_i32_9 = arith.constant 128 : i32
    %18 = arith.muli %arg1, %c128_i32_9 : i32
    %19 = tpu.iota {dimensions = array<i32: 1>} : vector<128x128xi32>
    %20 = vector.broadcast %18 : i32 to vector<128x128xi32>
    %21 = arith.addi %20, %19 : vector<128x128xi32>
    %22 = arith.cmpi slt, %17, %21 : vector<128x128xi32>
    %23 = vector.shape_cast %4 : vector<8x128xf32> to vector<8x128x1xf32>
    %24 = vector.shape_cast %3 : vector<8x128xf32> to vector<8x1x128xf32>
    %25 = vector.broadcast %23 : vector<8x128x1xf32> to vector<8x128x128xf32>
    %26 = vector.broadcast %24 : vector<8x1x128xf32> to vector<8x128x128xf32>
    %27 = arith.cmpf ogt, %25, %26 : vector<8x128x128xf32>
    %28 = vector.broadcast %23 : vector<8x128x1xf32> to vector<8x128x128xf32>
    %29 = vector.broadcast %24 : vector<8x1x128xf32> to vector<8x128x128xf32>
    %30 = arith.cmpf oeq, %28, %29 : vector<8x128x128xf32>
    %31 = vector.shape_cast %22 : vector<128x128xi1> to vector<1x128x128xi1>
    %32 = vector.broadcast %31 : vector<1x128x128xi1> to vector<8x128x128xi1>
    %33 = arith.andi %30, %32 : vector<8x128x128xi1>
    %34 = arith.ori %27, %33 : vector<8x128x128xi1>
    %35 = arith.extui %34 : vector<8x128x128xi1> to vector<8x128x128xi32>
    %36 = arith.sitofp %35 : vector<8x128x128xi32> to vector<8x128x128xf32>
    %37 = arith.truncf %36 : vector<8x128x128xf32> to vector<8x128x128xbf16>
    %38 = vector.shape_cast %37 : vector<8x128x128xbf16> to vector<1024x128xbf16>
    %c0_10 = arith.constant 0 : index
    %c0_11 = arith.constant 0 : index
    %39 = vector.load %arg8[%c0_10, %c0_11] : memref<8x128xf32, #tpu.memory_space<vmem>>, vector<8x128xf32>
    %c0_12 = arith.constant 0 : index
    %c0_13 = arith.constant 0 : index
    %40 = vector.load %arg10[%c0_12, %c0_13] : memref<8x1024xbf16, #tpu.memory_space<vmem>>, vector<8x1024xbf16>
    %cst_14 = arith.constant dense<0.000000e+00> : vector<8x128xf32>
    %41 = tpu.matmul %40, %38, %cst_14 {dimension_numbers = #tpu.dot_dimension_numbers<[1], [0], [0], [1], [0, 0, 1, 1], [], []>} : vector<8x1024xbf16>, vector<1024x128xbf16>, vector<8x128xf32> -> vector<8x128xf32>
    %42 = arith.addf %39, %41 : vector<8x128xf32>
    %c0_15 = arith.constant 0 : index
    %c0_16 = arith.constant 0 : index
    %43 = vector.load %arg8[%c0_15, %c0_16] : memref<8x128xf32, #tpu.memory_space<vmem>>, vector<8x128xf32>
    tpu.vector_store %arg8[%c0_15, %c0_16], %42 {strides = array<i32>} : memref<8x128xf32, #tpu.memory_space<vmem>>, vector<8x128xf32>,
    %c0_i32_17 = arith.constant 0 : i32
    %44 = arith.cmpi eq, %arg2, %c0_i32_17 : i32
    %45 = arith.extui %44 : i1 to i32
    %c0_i32_18 = arith.constant 0 : i32
    %46 = arith.cmpi ne, %45, %c0_i32_18 : i32
    scf.if %46 {
      %c0_19 = arith.constant 0 : index
      %c0_20 = arith.constant 0 : index
      %47 = vector.load %arg6[%c0_19, %c0_20] : memref<8x1xi32, #tpu.memory_space<vmem>>, vector<8x1xi32>
      %48 = arith.sitofp %47 : vector<8x1xi32> to vector<8x1xf32>
      %c0_21 = arith.constant 0 : index
      %c0_22 = arith.constant 0 : index
      %49 = vector.load %arg9[%c0_21, %c0_22] : memref<8x1xf32, #tpu.memory_space<vmem>>, vector<8x1xf32>
      %50 = arith.minimumf %48, %49 : vector<8x1xf32>
      %cst_23 = arith.constant 1.000000e+00 : f32
      %51 = vector.broadcast %cst_23 : f32 to vector<8x1xf32>
      %52 = arith.maximumf %50, %51 : vector<8x1xf32>
      %c0_24 = arith.constant 0 : index
      %c0_25 = arith.constant 0 : index
      %53 = vector.load %arg8[%c0_24, %c0_25] : memref<8x128xf32, #tpu.memory_space<vmem>>, vector<8x128xf32>
      %54 = vector.broadcast %52 : vector<8x1xf32> to vector<8x128xf32>
      %55 = arith.cmpf olt, %53, %54 : vector<8x128xf32>
      %c0_26 = arith.constant 0 : index
      %c0_27 = arith.constant 0 : index
      %56 = vector.load %arg5[%c0_26, %c0_27] : memref<8x128xi32, #tpu.memory_space<vmem>>, vector<8x128xi32>
      %c0_i32_28 = arith.constant 0 : i32
      %57 = vector.broadcast %c0_i32_28 : i32 to vector<8x128xi32>
      %58 = arith.cmpi sgt, %56, %57 : vector<8x128xi32>
      %59 = arith.andi %55, %58 : vector<8x128xi1>
      %60 = arith.extui %59 : vector<8x128xi1> to vector<8x128xi32>
      %c0_29 = arith.constant 0 : index
      %c0_30 = arith.constant 0 : index
      %61 = vector.load %arg7[%c0_29, %c0_30] : memref<8x128xi32, #tpu.memory_space<vmem>>, vector<8x128xi32>
      tpu.vector_store %arg7[%c0_29, %c0_30], %60 {strides = array<i32>} : memref<8x128xi32, #tpu.memory_space<vmem>>, vector<8x128xi32>,
    } else {
    }
    return
  }
  func.func @transform_0(%arg0: i32, %arg1: i32, %arg2: i32) -> (i32, i32) {
    %c0_i32 = arith.constant 0 : i32
    return %arg0, %arg1 : i32, i32
  }
  func.func @transform_1(%arg0: i32, %arg1: i32, %arg2: i32) -> (i32, i32) {
    %c0_i32 = arith.constant 0 : i32
    return %arg0, %arg2 : i32, i32
  }
  func.func @transform_2(%arg0: i32, %arg1: i32, %arg2: i32) -> (i32, i32) {
    %c0_i32 = arith.constant 0 : i32
    return %arg0, %arg1 : i32, i32
  }
  func.func @transform_3(%arg0: i32, %arg1: i32, %arg2: i32) -> (i32, i32) {
    %c0_i32 = arith.constant 0 : i32
    %c0_i32_0 = arith.constant 0 : i32
    return %arg0, %c0_i32 : i32, i32
  }
  func.func @transform_4(%arg0: i32, %arg1: i32, %arg2: i32) -> (i32, i32) {
    %c0_i32 = arith.constant 0 : i32
    return %arg0, %arg1 : i32, i32
  }
}

</mosaic_0001>

<bundles_post_ra>
// kernel: tpu_custom_call.1
= control target key start
LH: loop header
LB: loop body
LE: loop exit
PB: predicated region body
PF: predicated region fallthrough
CT: control target
= control target key end

     0   :  { %9 = vsyncpa [#allocation6], 0  ;;  %s4610_s0 = inlined_call_operand.vmem [shape: f32[8,128], index: 0, kind: input, shape index: {}]   ;;  %s4611_s1 = inlined_call_operand.hbm [shape: f32[8,128], index: 1, kind: input, shape index: {}]   ;;  %s4612_s2 = inlined_call_operand.hbm [shape: s32[8,128], index: 2, kind: input, shape index: {}]   ;;  %s4613_s3 = inlined_call_operand.vmem [shape: s32[8,1], index: 3, kind: input, shape index: {}]   ;;  %s4614_s4 = inlined_call_operand.hbm [shape: s32[8,128], index: 4, kind: output, shape index: {}]  }
   0x1   :  { %10 = vsyncpa [#allocation9], 0 }
   0x2   :  { %11 = vsyncpa [#allocation7], 0  ;;  %s19_s17 = sshll.u32 %s4611_s1, 4  ;;  %s2803_s18 = smov [#allocation5]   ;;  %s20_s17 = int_to_ptr.hbm [resolvable:$true] %s19_s17 }
   0x3   :  { %s21_s19 = sshll.u32 %s2803_s18, 4  ;;  %s30_s22 = sshll.u32 %s4612_s2, 4  ;;  %s22_s19 = int_to_ptr.vmem [resolvable:$true] %s21_s19  ;;  %s31_s22 = int_to_ptr.hbm [resolvable:$true] %s30_s22 }
   0x4   :  { %24 = dma.hbm_to_vmem [thread:$0]  %s20_s17, 128, %s22_s19, [#allocation6]  }
   0x5   :  { %s2804_s23 = smov [#allocation8]  }
   0x6   :  { %s32_s24 = sshll.u32 %s2804_s23, 4  ;;  %s33_s24 = int_to_ptr.vmem [resolvable:$true] %s32_s24 }
   0x7   :  { %35 = dma.hbm_to_vmem [thread:$0]  %s31_s22, 128, %s33_s24, [#allocation9]  }
   0x8   :  { %2797 = dma.done.wait [#allocation6], 128  }
   0x9   :  { %2798 = vsyncadd [#allocation6], 4294967168 }
   0xa   :  { %2799 = dma.done.wait [#allocation9], 128  }
   0xb   :  { %2800 = vsyncadd [#allocation9], 4294967168  ;;  %v53_v0 = vlaneseq  ;;  %v2854_v5 = vld [vmem:[#allocation5] sm:$0xff]  ;;  %v4621_v6 = vmov 0.0   ;;  %vm51_vm1 = vcmask 7168   ;;  %v2980_v33 = vld [vmem:[%s4610_s0] sm:$0xff] }
   0xc   :  { %vm118_vm0 = vcmp.ge.f32.partialorder %v2854_v5, 0.05  ;;  %v2859_v8 = vperm.slane %v2854_v5, 0  ;;  %v2869_v10 = vperm.slane %v2854_v5, 1  ;;  %v2899_v16 = vperm.slane %v2854_v5, 2  ;;  %52 = vst.msk [vmem:[#allocation3] sm:$0xff] %vm51_vm1, %v4621_v6 }
   0xd   :  { %v2840_v1 = vshrl.u32 %v53_v0, 7  ;;  %v2479_v7 = vsel %vm118_vm0, 1.0, %v4621_v6  ;;  %v2938_v22 = vperm.slane %v2854_v5, 3  ;;  %v2968_v30 = vperm.slane %v2854_v5, 4  ;;  %s2460_s5 = sshll.u32 %s4614_s4, 4  ;;  %s2461_s5 = int_to_ptr.hbm [resolvable:$true] %s2460_s5 }
   0xe   :  { %121 = vadd.xlane.f32.xlu0 %v2479_v7  ;;  %v960_v34 = vrot.slane %v2980_v33, 2  ;;  %v2990_v37 = vand.u32 127, %v53_v0  ;;  %v4720_v40 = vmov 0  ;;  %v3004_v42 = vperm.slane %v2980_v33, 0 }
   0xf   :  { %4710 = vst [vmem:[#allocation14_spill] sm:$0xff] %v2840_v1  ;;  %v2843_v2 = vadd.s32 24, %v2840_v1  ;;  %v2846_v3 = vadd.s32 8, %v2840_v1  ;;  %v2849_v4 = vadd.s32 16, %v2840_v1  ;;  %v2864_v9 = vadd.s32 32, %v2840_v1 }
  0x10   :  { %v2875_v11 = vadd.s32 48, %v2840_v1  ;;  %v2878_v12 = vadd.s32 40, %v2840_v1  ;;  %v2881_v13 = vadd.s32 96, %v2840_v1  ;;  %v2890_v14 = vadd.s32 64, %v2840_v1  ;;  %4718 = vst [vmem:[#allocation22_spill] sm:$0xff] %v2968_v30 }
  0x11   :  { %4711 = vst [vmem:[#allocation15_spill] sm:$0xff] %v2849_v4  ;;  %2615 = vset.pattern.permute.xlu2 %v2843_v2  ;;  %2613 = vset.pattern.permute.xlu1 %v2846_v3  ;;  %v2893_v15 = vadd.s32 56, %v2840_v1  ;;  %v2905_v17 = vadd.s32 80, %v2840_v1  ;;  %v2908_v18 = vadd.s32 72, %v2840_v1  ;;  %v2917_v19 = vadd.s32 88, %v2840_v1 }
  0x12   :  { %2629 = vset.pattern.permute.xlu0 %v2849_v4  ;;  %4712 = vst [vmem:[#allocation16_spill] sm:$0xff] %v2864_v9  ;;  %v2926_v20 = vadd.s32 120, %v2840_v1  ;;  %v2929_v21 = vadd.s32 112, %v2840_v1  ;;  %v2987_v36 = vperm.slane %v960_v34, 0  ;;  %vm2997_vm2 = vcmp.lt.s32.totalorder %v2846_v3, %v2990_v37 }
  0x13   :  { %4713 = vst [vmem:[#allocation17_spill] sm:$0xff] %v2878_v12  ;;  %v117_v25 = vld [vmem:[#allocation3] sm:$0xff]  ;;  %v4721_v40 = vsel %vm2997_vm2, 4294967295, %v4720_v40  ;;  %vm3016_vm7 = vcmp.lt.s32.totalorder %v2890_v14, %v2990_v37  ;;  %v4724_v44 = vmov 0  ;;  %v3028_v46 = vperm.slane %v2854_v5, 6 }
  0x14   :  { %4714 = vst [vmem:[#allocation18_spill] sm:$0xff] %v2890_v14  ;;  %v4725_v44 = vsel %vm3016_vm7, 4294967295, %v4724_v44  ;;  %vm3034_vm12 = vcmp.lt.s32.totalorder %v2908_v18, %v2990_v37  ;;  %v4727_v47 = vmov 0  ;;  %v3045_v51 = vadd.s32 104, %v2840_v1 }
  0x15   :  { %4715 = vst [vmem:[#allocation19_spill] sm:$0xff] %v2905_v17  ;;  %v4728_v47 = vsel %vm3034_vm12, 4294967295, %v4727_v47  ;;  %v4729_v54 = vmov 0  ;;  %v4731_v57 = vmov 0  ;;  %v4734_v58 = vmov 0 }
  0x16   :  { %4716 = vst [vmem:[#allocation20_spill] sm:$0xff] %v2917_v19  ;;  %v4736_v63 = vmov 0 }
  0x17   :  { %4717 = vst [vmem:[#allocation21_spill] sm:$0xff] %v2926_v20 }
  0x18   :  { %4719 = vst [vmem:[#allocation23_spill] sm:$0xff] %v2990_v37 }
  0x19   :  { %205 = vperm.xlu2 %2615, %v2859_v8   ;;  %193 = vperm.xlu1 %2613, %v2859_v8   ;;  %4726 = vst [vmem:[#allocation24_spill] sm:$0xff] %v3028_v46 }
  0x21   :  { %2616 = vset.pattern.permute.xlu2 %v2864_v9  ;;  %2614 = vset.pattern.permute.xlu1 %v2849_v4 }
  0x22   :  { %296 = vperm.xlu0 %2629, %v2869_v10  }
  0x29   :  { %211 = vperm.xlu2 %2616, %v2859_v8   ;;  %199 = vperm.xlu1 %2614, %v2859_v8  }
  0x2a   :  { %2638 = vset.pattern.permute.xlu0 %v2881_v13 }
  0x31   :  { %2618 = vset.pattern.permute.xlu2 %v2875_v11  ;;  %2617 = vset.pattern.permute.xlu1 %v2878_v12 }
  0x32   :  { %356 = vperm.xlu0 %2638, %v2869_v10  }
  0x39   :  { %223 = vperm.xlu2 %2618, %v2859_v8   ;;  %217 = vperm.xlu1 %2617, %v2859_v8  }
  0x3a   :  { %2643 = vset.pattern.permute.xlu0 %v2846_v3 }
  0x41   :  { %2620 = vset.pattern.permute.xlu2 %v2890_v14  ;;  %2619 = vset.pattern.permute.xlu1 %v2893_v15 }
  0x42   :  { %387 = vperm.xlu0 %2643, %v2899_v16  }
  0x49   :  { %235 = vperm.xlu2 %2620, %v2859_v8   ;;  %229 = vperm.xlu1 %2619, %v2859_v8  }
  0x4a   :  { %2648 = vset.pattern.permute.xlu0 %v2875_v11 }
  0x51   :  { %2622 = vset.pattern.permute.xlu2 %v2905_v17  ;;  %2621 = vset.pattern.permute.xlu1 %v2908_v18 }
  0x52   :  { %417 = vperm.xlu0 %2648, %v2899_v16  }
  0x59   :  { %247 = vperm.xlu2 %2622, %v2859_v8   ;;  %241 = vperm.xlu1 %2621, %v2859_v8  }
  0x5a   :  { %2653 = vset.pattern.permute.xlu0 %v2917_v19 }
  0x61   :  { %2624 = vset.pattern.permute.xlu2 %v2881_v13  ;;  %2623 = vset.pattern.permute.xlu1 %v2917_v19 }
  0x62   :  { %447 = vperm.xlu0 %2653, %v2899_v16  }
  0x69   :  { %259 = vperm.xlu2 %2624, %v2859_v8   ;;  %253 = vperm.xlu1 %2623, %v2859_v8  }
  0x6a   :  { %2654 = vset.pattern.permute.xlu0 %v2840_v1 }
  0x71   :  { %2626 = vset.pattern.permute.xlu2 %v2926_v20  ;;  %2625 = vset.pattern.permute.xlu1 %v2929_v21 }
  0x72   :  { %187 = vperm.xlu0 %2654, %v2859_v8  }
  0x73   :  { %v2956_v24 = vpop.permute.xlu2 %205 }
  0x79   :  { %277 = vperm.xlu2 %2626, %v2859_v8   ;;  %271 = vperm.xlu1 %2625, %v2859_v8  }
  0x7a   :  { %478 = vperm.xlu0 %2654, %v2938_v22  }
  0x81   :  { %2628 = vset.pattern.permute.xlu2 %v2846_v3  ;;  %2627 = vset.pattern.permute.xlu1 %v2840_v1  ;;  %v122_v23 = vpop.xlane.xlu0 %121 }
  0x82   :  { %2663 = vset.pattern.permute.xlu0 %v2878_v12  ;;  %v123_v26 = vadd.f32 %v122_v23, %v117_v25 }
  0x83   :  { %v2965_v29 = vpop.permute.xlu2 %211 }
  0x84   :  { %125 = vst.msk [vmem:[#allocation3] sm:$0xff] %vm51_vm1, %v123_v26  ;;  %vm3049_vm1 = vcmp.lt.s32.totalorder %v2875_v11, %v2990_v37 }
  0x85   :  { %v4730_v54 = vsel %vm3049_vm1, 4294967295, %v4729_v54 }
  0x89   :  { %290 = vperm.xlu2 %2628, %v2869_v10   ;;  %284 = vperm.xlu1 %2627, %v2869_v10  }
  0x8a   :  { %508 = vperm.xlu0 %2663, %v2938_v22  }
  0x8b   :  { %v2962_v28 = vpop.permute.xlu1 %193 }
  0x91   :  { %2631 = vset.pattern.permute.xlu2 %v2864_v9  ;;  %2630 = vset.pattern.permute.xlu1 %v2843_v2 }
  0x92   :  { %2668 = vset.pattern.permute.xlu0 %v2905_v17 }
  0x93   :  { %v2983_v35 = vpop.permute.xlu2 %223 }
  0x94   :  { %v2960_v27 = vpop.permute.xlu0 %296 }
  0x99   :  { %308 = vperm.xlu2 %2631, %v2869_v10   ;;  %302 = vperm.xlu1 %2630, %v2869_v10  }
  0x9a   :  { %538 = vperm.xlu0 %2668, %v2938_v22  }
  0x9b   :  { %v2972_v31 = vpop.permute.xlu1 %199 }
  0xa1   :  { %2633 = vset.pattern.permute.xlu2 %v2875_v11  ;;  %2632 = vset.pattern.permute.xlu1 %v2878_v12 }
  0xa2   :  { %2681 = vset.pattern.permute.xlu0 %v2908_v18 }
  0xa3   :  { %v236_v41 = vpop.permute.xlu2 %235 }
  0xa4   :  { %v2975_v32 = vpop.permute.xlu0 %356  ;;  %vm1118_vm8 = vcmp.eq.f32.partialorder %v236_v41, %v3004_v42  ;;  %vm990_vm9 = vcmp.gt.f32.partialorder %v236_v41, %v3004_v42  ;;  %v4740_v41 = vmov 0 }
  0xa5   :  { %vm1278_vm10 = vmand %vm1118_vm8, %vm3016_vm7 }
  0xa6   :  { %vm1406_vm11 = vmor %vm990_vm9, %vm1278_vm10  ;;  %vm3066_vm9 = vcmp.lt.s32.totalorder %v2905_v17, %v2990_v37 }
  0xa7   :  { %v2488_v48 = vsel %vm1406_vm11, 1.0, %v4621_v6  ;;  %v4735_v58 = vsel %vm3066_vm9, 4294967295, %v4734_v58 }
  0xa8   :  { %v1790_v53 = vpack.c.bf16 %v2488_v48, %v2488_v48 }
  0xa9   :  { %320 = vperm.xlu2 %2633, %v2869_v10   ;;  %314 = vperm.xlu1 %2632, %v2869_v10  }
  0xaa   :  { %629 = vperm.xlu0 %2681, %v2968_v30   ;;  %v3071_v59 = vunpack.c.l.b16 %v1790_v53 }
  0xab   :  { %v2992_v38 = vpop.permute.xlu1 %217 }
  0xb1   :  { %2635 = vset.pattern.permute.xlu2 %v2908_v18  ;;  %2634 = vset.pattern.permute.xlu1 %v2890_v14 }
  0xb2   :  { %2686 = vset.pattern.permute.xlu0 %v2929_v21 }
  0xb3   :  { %v248_v50 = vpop.permute.xlu2 %247 }
  0xb4   :  { %v388_v39 = vpop.permute.xlu0 %387  ;;  %vm1120_vm10 = vcmp.eq.f32.partialorder %v248_v50, %v3004_v42  ;;  %vm992_vm11 = vcmp.gt.f32.partialorder %v248_v50, %v3004_v42 }
  0xb5   :  { %vm1015_vm3 = vcmp.gt.f32.partialorder %v388_v39, %v2987_v36  ;;  %vm1143_vm4 = vcmp.eq.f32.partialorder %v388_v39, %v2987_v36  ;;  %v3101_v39 = vperm.slane %v2854_v5, 5 }
  0xb6   :  { %vm1303_vm5 = vmand %vm1143_vm4, %vm2997_vm2 }
  0xb7   :  { %vm3010_vm6 = vmor %vm1015_vm3, %vm1303_vm5  ;;  %4739 = vst [vmem:[#allocation27_spill] sm:$0xff] %v3101_v39 }
  0xb9   :  { %338 = vperm.xlu2 %2635, %v2869_v10   ;;  %332 = vperm.xlu1 %2634, %v2869_v10  }
  0xba   :  { %659 = vperm.xlu0 %2686, %v2968_v30  }
  0xbb   :  { %v3021_v45 = vpop.permute.xlu1 %229 }
  0xc1   :  { %2637 = vset.pattern.permute.xlu2 %v2917_v19  ;;  %2636 = vset.pattern.permute.xlu1 %v2905_v17 }
  0xc2   :  { %853 = vperm.xlu0 %2686, %v3028_v46  }
  0xc3   :  { %v3081_v62 = vpop.permute.xlu2 %259 }
  0xc4   :  { %v418_v52 = vpop.permute.xlu0 %417 }
  0xc5   :  { %vm1020_vm3 = vcmp.gt.f32.partialorder %v418_v52, %v2987_v36  ;;  %vm1148_vm4 = vcmp.eq.f32.partialorder %v418_v52, %v2987_v36 }
  0xc6   :  { %vm1308_vm5 = vmand %vm1148_vm4, %vm3049_vm1 }
  0xc7   :  { %vm3060_vm8 = vmor %vm1020_vm3, %vm1308_vm5 }
  0xc8   :  { %v4732_v57 = vsel %vm3060_vm8, 4294967295, %v4731_v57 }
  0xc9   :  { %350 = vperm.xlu2 %2637, %v2869_v10   ;;  %344 = vperm.xlu1 %2636, %v2869_v10   ;;  %4733 = vst [vmem:[#allocation25_spill] sm:$0xff] %v4732_v57 }
  0xca   :  { %2699 = vset.pattern.permute.xlu0 %v2926_v20 }
  0xcb   :  { %v242_v49 = vpop.permute.xlu1 %241 }
  0xcc   :  { %vm991_vm13 = vcmp.gt.f32.partialorder %v242_v49, %v3004_v42  ;;  %vm1119_vm14 = vcmp.eq.f32.partialorder %v242_v49, %v3004_v42  ;;  %v4742_v49 = vmov 0 }
  0xcd   :  { %vm1279_vm15 = vmand %vm1119_vm14, %vm3034_vm12 }
  0xce   :  { %vm1407_vm0 = vmor %vm991_vm13, %vm1279_vm15  ;;  %vm3087_vm15 = vcmp.lt.s32.totalorder %v2917_v19, %v2990_v37 }
  0xcf   :  { %v2489_v55 = vsel %vm1407_vm0, 1.0, %v4621_v6  ;;  %vm1280_vm13 = vmand %vm1120_vm10, %vm3066_vm9  ;;  %v4737_v63 = vsel %vm3087_vm15, 4294967295, %v4736_v63 }
  0xd0   :  { %v1791_v56 = vpack.c.bf16 %v2489_v55, %v2489_v55  ;;  %vm1408_vm14 = vmor %vm992_vm11, %vm1280_vm13  ;;  %4738 = vst [vmem:[#allocation26_spill] sm:$0xff] %v4737_v63  ;;  %v959_v55 = vrot.slane %v2980_v33, 1 }
  0xd1   :  { %2640 = vset.pattern.permute.xlu2 %v2929_v21  ;;  %2639 = vset.pattern.permute.xlu1 %v3045_v51  ;;  %v2490_v0 = vsel %vm1408_vm14, 1.0, %v4621_v6  ;;  %vm3107_vm14 = vcmp.lt.s32.totalorder %v2926_v20, %v2990_v37 }
  0xd2   :  { %v3073_v60 = vunpack.c.l.b16 %v1791_v56  ;;  %568 = vperm.xlu0 %2699, %v2938_v22   ;;  %v1792_v26 = vpack.c.bf16 %v2490_v0, %v2490_v0  ;;  %v4741_v41 = vsel %vm3107_vm14, 4294967295, %v4740_v41  ;;  %v4744_v0 = vmov 0 }
  0xd3   :  { %v278_v23 = vpop.permute.xlu2 %277 }
  0xd4   :  { %v448_v25 = vpop.permute.xlu0 %447  ;;  %v3118_v50 = vunpack.c.l.b16 %v1792_v26 }
  0xd5   :  { %vm1025_vm10 = vcmp.gt.f32.partialorder %v448_v25, %v2987_v36  ;;  %vm1153_vm11 = vcmp.eq.f32.partialorder %v448_v25, %v2987_v36 }
  0xd6   :  { %vm1313_vm13 = vmand %vm1153_vm11, %vm3087_vm15 }
  0xd9   :  { %368 = vperm.xlu2 %2640, %v2869_v10   ;;  %362 = vperm.xlu1 %2639, %v2869_v10  }
  0xda   :  { %762 = vperm.xlu0 %2699, %v3101_v39  }
  0xdb   :  { %v254_v7 = vpop.permute.xlu1 %253 }
  0xdc   :  { %vm993_vm0 = vcmp.gt.f32.partialorder %v254_v7, %v3004_v42  ;;  %vm1121_vm3 = vcmp.eq.f32.partialorder %v254_v7, %v3004_v42 }
  0xdd   :  { %vm1281_vm4 = vmand %vm1121_vm3, %vm3087_vm15 }
  0xde   :  { %vm1409_vm5 = vmor %vm993_vm0, %vm1281_vm4  ;;  %vm1125_vm0 = vcmp.eq.f32.partialorder %v278_v23, %v3004_v42  ;;  %vm997_vm4 = vcmp.gt.f32.partialorder %v278_v23, %v3004_v42  ;;  %v3138_v23 = vperm.slane %v959_v55, 0 }
  0xdf   :  { %v2491_v34 = vsel %vm1409_vm5, 1.0, %v4621_v6  ;;  %vm3114_vm3 = vmor %vm1025_vm10, %vm1313_vm13  ;;  %vm3134_vm10 = vcmp.lt.s32.totalorder %v2929_v21, %v2990_v37 }
  0xe0   :  { %v1793_v48 = vpack.c.bf16 %v2491_v34, %v2491_v34  ;;  %v4743_v49 = vsel %vm3114_vm3, 4294967295, %v4742_v49  ;;  %vm1285_vm5 = vmand %vm1125_vm0, %vm3107_vm14  ;;  %v4745_v0 = vsel %vm3134_vm10, 4294967295, %v4744_v0 }
  0xe1   :  { %2642 = vset.pattern.permute.xlu2 %v2840_v1  ;;  %2641 = vset.pattern.permute.xlu1 %v2926_v20  ;;  %vm1413_vm11 = vmor %vm997_vm4, %vm1285_vm5 }
  0xe2   :  { %v3120_v52 = vunpack.c.l.b16 %v1793_v48  ;;  %v2495_v56 = vsel %vm1413_vm11, 1.0, %v4621_v6  ;;  %2702 = vset.pattern.permute.xlu0 %v3045_v51 }
  0xe3   :  { %v1797_v25 = vpack.c.bf16 %v2495_v56, %v2495_v56  ;;  %v291_v26 = vpop.permute.xlu2 %290 }
  0xe4   :  { %vm1127_vm11 = vcmp.eq.f32.partialorder %v291_v26, %v3138_v23  ;;  %vm999_vm8 = vcmp.gt.f32.partialorder %v291_v26, %v3138_v23  ;;  %v3162_v26 = vpop.permute.xlu0 %187 }
  0xe5   :  { %v2086_v61 = vunpack.c.l.b16 %v1797_v25  ;;  %vm1287_vm3 = vmand %vm1127_vm11, %vm2997_vm2  ;;  %vm1128_vm11 = vcmp.eq.f32.partialorder %v2960_v27, %v3138_v23 }
  0xe9   :  { %381 = vperm.xlu2 %2642, %v2899_v16   ;;  %374 = vperm.xlu1 %2641, %v2869_v10  }
  0xea   :  { %265 = vperm.xlu0 %2702, %v2859_v8  }
  0xeb   :  { %v272_v7 = vpop.permute.xlu1 %271 }
  0xec   :  { %vm996_vm13 = vcmp.gt.f32.partialorder %v272_v7, %v3004_v42  ;;  %vm1124_vm0 = vcmp.eq.f32.partialorder %v272_v7, %v3004_v42 }
  0xed   :  { %vm1284_vm4 = vmand %vm1124_vm0, %vm3134_vm10  ;;  %vm3158_vm0 = vcmp.lt.s32.totalorder %v2840_v1, %v2990_v37  ;;  %v4757_v1 = vmov 0 }
  0xee   :  { %vm1412_vm5 = vmor %vm996_vm13, %vm1284_vm4 }
  0xef   :  { %v2494_v34 = vsel %vm1412_vm5, 1.0, %v4621_v6  ;;  %vm1415_vm13 = vmor %vm999_vm8, %vm1287_vm3 }
  0xf0   :  { %v1796_v48 = vpack.c.bf16 %v2494_v34, %v2494_v34  ;;  %v2497_v7 = vsel %vm1415_vm13, 1.0, %v4621_v6  ;;  %v4746_v34 = vmov 0  ;;  %vm3181_vm13 = vcmp.lt.s32.totalorder %v2849_v4, %v2990_v37 }
  0xf1   :  { %2645 = vset.pattern.permute.xlu2 %v2843_v2  ;;  %2644 = vset.pattern.permute.xlu1 %v2849_v4  ;;  %v4747_v34 = vsel %vm3158_vm0, 4294967295, %v4746_v34  ;;  %v1799_v8 = vpack.c.bf16 %v2497_v7, %v2497_v7  ;;  %v4749_v7 = vmov 0 }
  0xf2   :  { %v2085_v55 = vunpack.c.l.b16 %v1796_v48  ;;  %750 = vperm.xlu0 %2702, %v3101_v39   ;;  %v4750_v7 = vsel %vm3181_vm13, 4294967295, %v4749_v7 }
  0xf4   :  { %v2206_v56 = vpack.c.b16 %v2086_v61, %v2085_v55  ;;  %v961_v61 = vrot.slane %v2980_v33, 3 }
  0xf6   :  { %2327 = vmatpush.bf16.msra.mxu0 %v2206_v56  ;;  %v3173_v56 = vunpack.c.l.b16 %v1799_v8  ;;  %v3175_v53 = vperm.slane %v961_v61, 0  ;;  %v479_v8 = vpop.permute.xlu0 %478  ;;  %v4755_v61 = vmov 0 }
  0xf8   :  { %4748 = vst [vmem:[#allocation28_spill] sm:$0xff] %v3173_v56 }
  0xf9   :  { %399 = vperm.xlu2 %2645, %v2899_v16   ;;  %393 = vperm.xlu1 %2644, %v2899_v16  }
  0xfa   :  { %2705 = vset.pattern.permute.xlu0 %v2890_v14 }
  0xfb   :  { %v285_v25 = vpop.permute.xlu1 %284 }
  0xfc   :  { %vm998_vm4 = vcmp.gt.f32.partialorder %v285_v25, %v3138_v23  ;;  %vm1126_vm8 = vcmp.eq.f32.partialorder %v285_v25, %v3138_v23 }
  0xfd   :  { %vm1286_vm3 = vmand %vm1126_vm8, %vm3158_vm0 }
  0xfe   :  { %vm1414_vm5 = vmor %vm998_vm4, %vm1286_vm3  ;;  %vm1000_vm4 = vcmp.gt.f32.partialorder %v2960_v27, %v3138_v23  ;;  %vm1030_vm3 = vcmp.gt.f32.partialorder %v479_v8, %v3175_v53 }
  0xff   :  { %v2496_v48 = vsel %vm1414_vm5, 1.0, %v4621_v6  ;;  %vm1288_vm8 = vmand %vm1128_vm11, %vm3181_vm13  ;;  %vm1158_vm5 = vcmp.eq.f32.partialorder %v479_v8, %v3175_v53  ;;  %vm3207_vm11 = vcmp.lt.s32.totalorder %v2843_v2, %v2990_v37 }
 0x100   :  { %v1798_v55 = vpack.c.bf16 %v2496_v48, %v2496_v48  ;;  %vm1416_vm2 = vmor %vm1000_vm4, %vm1288_vm8  ;;  %v4752_v48 = vmov 0  ;;  %v4756_v61 = vsel %vm3207_vm11, 4294967295, %v4755_v61 }
 0x101   :  { %2647 = vset.pattern.permute.xlu2 %v2878_v12  ;;  %2646 = vset.pattern.permute.xlu1 %v2864_v9  ;;  %vm1318_vm1 = vmand %vm1158_vm5, %vm3158_vm0  ;;  %v2498_v27 = vsel %vm1416_vm2, 1.0, %v4621_v6  ;;  %v309_v6 = vpop.permute.xlu2 %308 }
 0x102   :  { %v3185_v25 = vunpack.c.l.b16 %v1798_v55  ;;  %vm3198_vm7 = vmor %vm1030_vm3, %vm1318_vm1  ;;  %720 = vperm.xlu0 %2705, %v3101_v39   ;;  %v1800_v8 = vpack.c.bf16 %v2498_v27, %v2498_v27  ;;  %vm3218_vm3 = vcmp.lt.s32.totalorder %v2878_v12, %v2990_v37  ;;  %v4761_v12 = vmov 0 }
 0x103   :  { %v4753_v48 = vsel %vm3198_vm7, 4294967295, %v4752_v48  ;;  %v4758_v1 = vsel %vm3218_vm3, 4294967295, %v4757_v1 }
 0x104   :  { %4751 = vst [vmem:[#allocation29_spill] sm:$0xff] %v3185_v25  ;;  %v4759_v25 = vmov 0.0  }
 0x105   :  { %4754 = vst [vmem:[#allocation30_spill] sm:$0xff] %v4753_v48  ;;  %v509_v48 = vpop.permute.xlu0 %508 }
 0x106   :  { %vm1035_vm5 = vcmp.gt.f32.partialorder %v509_v48, %v3175_v53  ;;  %vm1163_vm7 = vcmp.eq.f32.partialorder %v509_v48, %v3175_v53  ;;  %v4765_v48 = vmov 0 }
 0x107   :  { %vm1323_vm13 = vmand %vm1163_vm7, %vm3218_vm3  ;;  %vm1002_vm7 = vcmp.gt.f32.partialorder %v309_v6, %v3138_v23 }
 0x109   :  { %411 = vperm.xlu2 %2647, %v2899_v16   ;;  %405 = vperm.xlu1 %2646, %v2899_v16  }
 0x10a   :  { %817 = vperm.xlu0 %2705, %v3028_v46  }
 0x10b   :  { %v303_v55 = vpop.permute.xlu1 %302 }
 0x10c   :  { %vm1001_vm1 = vcmp.gt.f32.partialorder %v303_v55, %v3138_v23  ;;  %vm1129_vm4 = vcmp.eq.f32.partialorder %v303_v55, %v3138_v23  ;;  %v3227_v55 = vunpack.c.l.b16 %v1800_v8 }
 0x10d   :  { %vm1289_vm2 = vmand %vm1129_vm4, %vm3207_vm11  ;;  %v539_v8 = vpop.permute.xlu0 %538 }
 0x10e   :  { %vm1417_vm8 = vmor %vm1001_vm1, %vm1289_vm2  ;;  %4760 = vst [vmem:[#allocation31_spill] sm:$0xff] %v3227_v55  ;;  %vm1130_vm1 = vcmp.eq.f32.partialorder %v309_v6, %v3138_v23  ;;  %vm3240_vm2 = vcmp.lt.s32.totalorder %v2864_v9, %v2990_v37  ;;  %v4767_v6 = vmov 0 }
 0x10f   :  { %v2499_v56 = vsel %vm1417_vm8, 1.0, %v4759_v25  ;;  %vm3232_vm4 = vmor %vm1035_vm5, %vm1323_vm13  ;;  %v4766_v48 = vsel %vm3240_vm2, 4294967295, %v4765_v48  ;;  %vm1040_vm5 = vcmp.gt.f32.partialorder %v539_v8, %v3175_v53 }
 0x110   :  { %v1801_v27 = vpack.c.bf16 %v2499_v56, %v2499_v56  ;;  %v4762_v12 = vsel %vm3232_vm4, 4294967295, %v4761_v12  ;;  %vm1290_vm8 = vmand %vm1130_vm1, %vm3240_vm2  ;;  %vm1168_vm4 = vcmp.eq.f32.partialorder %v539_v8, %v3175_v53  ;;  %vm4792_vm2 = vnez %v4737_v63 }
 0x111   :  { %2650 = vset.pattern.permute.xlu2 %v2890_v14  ;;  %2649 = vset.pattern.permute.xlu1 %v2893_v15  ;;  %4763 = vst [vmem:[#allocation32_spill] sm:$0xff] %v4762_v12  ;;  %vm1418_vm13 = vmor %vm1002_vm7, %vm1290_vm8  ;;  %v3274_v14 = vpop.permute.xlu2 %320 }
 0x112   :  { %v3236_v19 = vunpack.c.l.b16 %v1801_v27  ;;  %vm1328_vm11 = vmand %vm1168_vm4, %vm3066_vm9  ;;  %v2500_v27 = vsel %vm1418_vm13, 1.0, %v4759_v25  ;;  %2708 = vset.pattern.permute.xlu0 %v2893_v15 }
 0x113   :  { %vm3256_vm15 = vmor %vm1040_vm5, %vm1328_vm11  ;;  %v1802_v8 = vpack.c.bf16 %v2500_v27, %v2500_v27 }
 0x114   :  { %4764 = vst [vmem:[#allocation33_spill] sm:$0xff] %v3236_v19  ;;  %v4768_v6 = vsel %vm3256_vm15, 4294967295, %v4767_v6  ;;  %v962_v19 = vrot.slane %v2980_v33, 4 }
 0x115   :  { %4769 = vst [vmem:[#allocation34_spill] sm:$0xff] %v4768_v6  ;;  %v3270_v6 = vunpack.c.l.b16 %v1802_v8 }
 0x116   :  { %v3279_v27 = vperm.slane %v962_v19, 0 }
 0x118   :  { %4770 = vst [vmem:[#allocation35_spill] sm:$0xff] %v3279_v27 }
 0x119   :  { %429 = vperm.xlu2 %2650, %v2899_v16   ;;  %423 = vperm.xlu1 %2649, %v2899_v16  }
 0x11a   :  { %326 = vperm.xlu0 %2708, %v2869_v10   ;;  %v3291_v10 = vpop.permute.xlu2 %338 }
 0x11b   :  { %v315_v56 = vpop.permute.xlu1 %314 }
 0x11c   :  { %vm1003_vm1 = vcmp.gt.f32.partialorder %v315_v56, %v3138_v23  ;;  %vm1131_vm7 = vcmp.eq.f32.partialorder %v315_v56, %v3138_v23 }
 0x11d   :  { %vm1291_vm4 = vmand %vm1131_vm7, %vm3218_vm3 }
 0x11e   :  { %vm1419_vm8 = vmor %vm1003_vm1, %vm1291_vm4 }
 0x11f   :  { %v2501_v12 = vsel %vm1419_vm8, 1.0, %v4759_v25 }
 0x120   :  { %v1803_v55 = vpack.c.bf16 %v2501_v12, %v2501_v12  ;;  %v630_v12 = vpop.permute.xlu0 %629 }
 0x121   :  { %2652 = vset.pattern.permute.xlu2 %v2905_v17  ;;  %2651 = vset.pattern.permute.xlu1 %v2908_v18  ;;  %vm1055_vm11 = vcmp.gt.f32.partialorder %v630_v12, %v3279_v27  ;;  %vm1183_vm13 = vcmp.eq.f32.partialorder %v630_v12, %v3279_v27  ;;  %v4774_v12 = vmov 0 }
 0x122   :  { %v3272_v57 = vunpack.c.l.b16 %v1803_v55  ;;  %vm1343_vm5 = vmand %vm1183_vm13, %vm3034_vm12  ;;  %v4771_v55 = vmov 0  ;;  %811 = vperm.xlu0 %2708, %v3028_v46   ;;  %v3311_v46 = vperm.slane %v2854_v5, 7 }
 0x123   :  { %vm3287_vm1 = vmor %vm1055_vm11, %vm1343_vm5  ;;  %v3296_v19 = vpop.permute.xlu2 %350 }
 0x124   :  { %v4772_v55 = vsel %vm3287_vm1, 4294967295, %v4771_v55  ;;  %4777 = vst [vmem:[#allocation38_spill] sm:$0xff] %v3311_v46 }
 0x125   :  { %4773 = vst [vmem:[#allocation36_spill] sm:$0xff] %v4772_v55 }
 0x129   :  { %441 = vperm.xlu2 %2652, %v2899_v16   ;;  %435 = vperm.xlu1 %2651, %v2899_v16  }
 0x12a   :  { %2712 = vset.pattern.permute.xlu0 %v2864_v9 }
 0x12b   :  { %v3316_v55 = vpop.permute.xlu1 %332 }
 0x12c   :  { %v660_v8 = vpop.permute.xlu0 %659 }
 0x12d   :  { %vm1060_vm7 = vcmp.gt.f32.partialorder %v660_v8, %v3279_v27  ;;  %vm1188_vm4 = vcmp.eq.f32.partialorder %v660_v8, %v3279_v27  ;;  %v2513_v8 = vsel %vm3010_vm6, 1.0, %v4759_v25 }
 0x12e   :  { %vm1348_vm8 = vmand %vm1188_vm4, %vm3134_vm10  ;;  %vm1138_vm4 = vcmp.eq.f32.partialorder %v2975_v32, %v3138_v23 }
 0x12f   :  { %vm3305_vm11 = vmor %vm1060_vm7, %vm1348_vm8 }
 0x130   :  { %v4775_v12 = vsel %vm3305_vm11, 4294967295, %v4774_v12 }
 0x131   :  { %2656 = vset.pattern.permute.xlu2 %v3045_v51  ;;  %2655 = vset.pattern.permute.xlu1 %v2881_v13  ;;  %4776 = vst [vmem:[#allocation37_spill] sm:$0xff] %v4775_v12  ;;  %v1815_v12 = vpack.c.bf16 %v2513_v8, %v2513_v8 }
 0x132   :  { %599 = vperm.xlu0 %2712, %v2968_v30  }
 0x133   :  { %v369_v56 = vpop.permute.xlu2 %368 }
 0x134   :  { %v3320_v17 = vpop.permute.xlu0 %853  ;;  %vm1140_vm8 = vcmp.eq.f32.partialorder %v369_v56, %v3138_v23  ;;  %vm1012_vm15 = vcmp.gt.f32.partialorder %v369_v56, %v3138_v23  ;;  %v4790_v56 = vmov 0 }
 0x135   :  { %4778 = vst [vmem:[#allocation39_spill] sm:$0xff] %v3320_v17  ;;  %vm3358_vm11 = vmand %vm1140_vm8, %vm3134_vm10 }
 0x139   :  { %459 = vperm.xlu2 %2656, %v2899_v16   ;;  %453 = vperm.xlu1 %2655, %v2899_v16  }
 0x13a   :  { %890 = vperm.xlu0 %2712, %v3311_v46  }
 0x13b   :  { %v345_v30 = vpop.permute.xlu1 %344 }
 0x13c   :  { %vm1136_vm3 = vcmp.eq.f32.partialorder %v345_v30, %v3138_v23 }
 0x141   :  { %2658 = vset.pattern.permute.xlu2 %v2926_v20  ;;  %2657 = vset.pattern.permute.xlu1 %v2929_v21  ;;  %v3328_v20 = vunpack.c.l.b16 %v1815_v12  ;;  %v4781_v12 = vmov 0 }
 0x142   :  { %2717 = vset.pattern.permute.xlu0 %v2843_v2 }
 0x143   :  { %v382_v27 = vpop.permute.xlu2 %381  ;;  %4779 = vst [vmem:[#allocation40_spill] sm:$0xff] %v3328_v20  ;;  %v4805_v20 = vmov 0 }
 0x144   :  { %vm1014_vm13 = vcmp.gt.f32.partialorder %v382_v27, %v2987_v36  ;;  %vm1142_vm5 = vcmp.eq.f32.partialorder %v382_v27, %v2987_v36  ;;  %v569_v8 = vpop.permute.xlu0 %568  ;;  %v4787_v27 = vmov 0 }
 0x145   :  { %vm1302_vm7 = vmand %vm1142_vm5, %vm3158_vm0  ;;  %vm1045_vm1 = vcmp.gt.f32.partialorder %v569_v8, %v3175_v53 }
 0x146   :  { %vm1430_vm6 = vmor %vm1014_vm13, %vm1302_vm7  ;;  %vm3342_vm13 = vcmp.lt.s32.totalorder %v2881_v13, %v2990_v37  ;;  %vm1010_vm7 = vcmp.gt.f32.partialorder %v2975_v32, %v3138_v23  ;;  %v963_v32 = vrot.slane %v2980_v33, 5 }
 0x147   :  { %v2512_v5 = vsel %vm1430_vm6, 1.0, %v4759_v25  ;;  %v4782_v12 = vsel %vm3342_vm13, 4294967295, %v4781_v12  ;;  %vm3348_vm5 = vmand %vm1138_vm4, %vm3342_vm13  ;;  %vm1173_vm4 = vcmp.eq.f32.partialorder %v569_v8, %v3175_v53  ;;  %vm1135_vm6 = vcmp.eq.f32.partialorder %v3291_v10, %v3138_v23 }
 0x148   :  { %v1814_v43 = vpack.c.bf16 %v2512_v5, %v2512_v5  ;;  %vm1333_vm0 = vmand %vm1173_vm4, %vm3107_vm14  ;;  %vm1009_vm4 = vcmp.gt.f32.partialorder %v3296_v19, %v3138_v23  ;;  %vm4793_vm14 = vcmp.eq.f32.partialorder %v3296_v19, %v3138_v23  ;;  %v4796_v8 = vmov 0 }
 0x149   :  { %471 = vperm.xlu2 %2658, %v2899_v16   ;;  %465 = vperm.xlu1 %2657, %v2899_v16   ;;  %vm3373_vm8 = vmor %vm1045_vm1, %vm1333_vm0  ;;  %v4800_v19 = vmov 0  ;;  %v3418_v5 = vperm.slane %v963_v32, 0 }
 0x14a   :  { %v3332_v17 = vunpack.c.l.b16 %v1814_v43  ;;  %v4788_v27 = vsel %vm3373_vm8, 4294967295, %v4787_v27  ;;  %vm3379_vm10 = vmor %vm1010_vm7, %vm3348_vm5  ;;  %690 = vperm.xlu0 %2717, %v3101_v39  }
 0x14b   :  { %v363_v43 = vpop.permute.xlu1 %362  ;;  %4789 = vst [vmem:[#allocation42_spill] sm:$0xff] %v4788_v27  ;;  %v4791_v56 = vsel %vm3379_vm10, 4294967295, %v4790_v56  ;;  %vm1297_vm13 = vmand %vm4793_vm14, %vm4792_vm2  ;;  %vm3410_vm14 = vcmp.lt.s32.totalorder %v3045_v51, %v2990_v37  ;;  %v4802_v27 = vmov 0  ;;  %vm4804_vm2 = vnez %v4756_v61 }
 0x14c   :  { %4780 = vst [vmem:[#allocation41_spill] sm:$0xff] %v3332_v17  ;;  %vm3392_vm0 = vmor %vm1012_vm15, %vm3358_vm11  ;;  %v4801_v19 = vsel %vm3410_vm14, 4294967295, %v4800_v19  ;;  %vm1139_vm15 = vcmp.eq.f32.partialorder %v363_v43, %v3138_v23  ;;  %v763_v17 = vpop.permute.xlu0 %762 }
 0x14d   :  { %vm3398_vm1 = vmand %vm1135_vm6, %vm3034_vm12  ;;  %vm1077_vm10 = vcmp.gt.f32.partialorder %v763_v17, %v3418_v5 }
 0x14e   :  { %v4797_v8 = vsel %vm3398_vm1, 4294967295, %v4796_v8  ;;  %vm3404_vm5 = vmand %vm1136_vm3, %vm3066_vm9  ;;  %vm1122_vm3 = vcmp.eq.f32.partialorder %v3081_v62, %v3004_v42  ;;  %vm1011_vm9 = vcmp.gt.f32.partialorder %v363_v43, %v3138_v23 }
 0x14f   :  { %vm3422_vm6 = vmor %vm1009_vm4, %vm1297_vm13  ;;  %vm1205_vm13 = vcmp.eq.f32.partialorder %v763_v17, %v3418_v5  ;;  %vm4807_vm4 = vnez %v4782_v12  ;;  %v4811_v17 = vmov 0 }
 0x150   :  { %v4803_v27 = vsel %vm3422_vm6, 4294967295, %v4802_v27  ;;  %vm1299_vm1 = vmand %vm1139_vm15, %vm3410_vm14 }
 0x151   :  { %2660 = vset.pattern.permute.xlu2 %v2849_v4  ;;  %2659 = vset.pattern.permute.xlu1 %v2846_v3  ;;  %vm3439_vm6 = vmand %vm1122_vm3, %vm4807_vm4  ;;  %vm4814_vm4 = vnez %v4725_v44 }
 0x152   :  { %vm1427_vm3 = vmor %vm1011_vm9, %vm1299_vm1  ;;  %884 = vperm.xlu0 %2717, %v3311_v46  }
 0x153   :  { %v400_v16 = vpop.permute.xlu2 %399 }
 0x154   :  { %vm1017_vm11 = vcmp.gt.f32.partialorder %v400_v16, %v2987_v36  ;;  %vm1145_vm7 = vcmp.eq.f32.partialorder %v400_v16, %v2987_v36 }
 0x155   :  { %vm1305_vm8 = vmand %vm1145_vm7, %vm4804_vm2  ;;  %vm1008_vm2 = vcmp.gt.f32.partialorder %v345_v30, %v3138_v23  ;;  %v2510_v30 = vsel %vm3392_vm0, 1.0, %v4759_v25  ;;  %vm1006_vm0 = vcmp.gt.f32.partialorder %v3316_v55, %v3138_v23 }
 0x156   :  { %vm3428_vm12 = vmor %vm1017_vm11, %vm1305_vm8  ;;  %vm1134_vm8 = vcmp.eq.f32.partialorder %v3316_v55, %v3138_v23  ;;  %vm4810_vm11 = vnez %v4741_v41  ;;  %v1812_v63 = vpack.c.bf16 %v2510_v30, %v2510_v30 }
 0x157   :  { %v4806_v20 = vsel %vm3428_vm12, 4294967295, %v4805_v20  ;;  %vm1365_vm7 = vmand %vm1205_vm13, %vm4810_vm11  ;;  %vm1007_vm13 = vcmp.gt.f32.partialorder %v3291_v10, %v3138_v23  ;;  %v2509_v10 = vsel %vm1427_vm3, 1.0, %v4759_v25  ;;  %vm4825_vm3 = vnez %v4803_v27 }
 0x158   :  { %vm3450_vm15 = vmor %vm1077_vm10, %vm1365_vm7  ;;  %vm994_vm7 = vcmp.gt.f32.partialorder %v3081_v62, %v3004_v42  ;;  %v2507_v30 = vsel %vm4825_vm3, 1.0, %v4759_v25  ;;  %v1811_v4 = vpack.c.bf16 %v2509_v10, %v2509_v10  ;;  %v4826_v27 = vmov 0 }
 0x159   :  { %490 = vperm.xlu2 %2660, %v2938_v22   ;;  %484 = vperm.xlu1 %2659, %v2938_v22   ;;  %v4812_v17 = vsel %vm3450_vm15, 4294967295, %v4811_v17  ;;  %vm3456_vm12 = vmand %vm1134_vm8, %vm4814_vm4  ;;  %vm4819_vm8 = vnez %v4791_v56  ;;  %vm4820_vm15 = vnez %v4797_v8  ;;  %v2101_v43 = vunpack.c.l.b16 %v1812_v63 }
 0x15a   :  { %4813 = vst [vmem:[#allocation43_spill] sm:$0xff] %v4812_v17  ;;  %vm3467_vm10 = vmor %vm1008_vm2, %vm3404_vm5  ;;  %v2508_v33 = vsel %vm4819_vm8, 1.0, %v4759_v25  ;;  %vm4833_vm3 = vnez %v4766_v48 }
 0x15b   :  { %v375_v16 = vpop.permute.xlu1 %374  ;;  %vm3486_vm4 = vmor %vm1007_vm13, %vm4820_vm15  ;;  %v1810_v46 = vpack.c.bf16 %v2508_v33, %v2508_v33  ;;  %vm1116_vm15 = vcmp.eq.f32.partialorder %v2983_v35, %v3004_v42  ;;  %v2506_v8 = vsel %vm3467_vm10, 1.0, %v4759_v25  ;;  %vm3511_vm13 = vcmp.lt.s32.totalorder %v2893_v15, %v2990_v37 }
 0x15c   :  { %vm1013_vm9 = vcmp.gt.f32.partialorder %v375_v16, %v3138_v23  ;;  %vm1141_vm1 = vcmp.eq.f32.partialorder %v375_v16, %v3138_v23  ;;  %vm3493_vm8 = vmor %vm1006_vm0, %vm3456_vm12  ;;  %vm988_vm12 = vcmp.gt.f32.partialorder %v2983_v35, %v3004_v42  ;;  %v4827_v27 = vsel %vm3511_vm13, 4294967295, %v4826_v27  ;;  %v266_v16 = vpop.permute.xlu0 %265 }
 0x15d   :  { %vm1301_vm2 = vmand %vm1141_vm1, %vm4810_vm11  ;;  %v2505_v39 = vsel %vm3486_vm4, 1.0, %v4759_v25  ;;  %v2504_v10 = vsel %vm3493_vm8, 1.0, %v4759_v25  ;;  %vm4828_vm1 = vnez %v4730_v54  ;;  %v2099_v63 = vunpack.c.l.b16 %v1810_v46 }
 0x15e   :  { %vm1429_vm5 = vmor %vm1013_vm9, %vm1301_vm2  ;;  %vm1117_vm9 = vcmp.eq.f32.partialorder %v3021_v45, %v3004_v42  ;;  %v2100_v37 = vunpack.c.l.b16 %v1811_v4  ;;  %v1808_v32 = vpack.c.bf16 %v2506_v8, %v2506_v8  ;;  %vm1114_vm2 = vcmp.eq.f32.partialorder %v2965_v29, %v3004_v42 }
 0x15f   :  { %v2511_v56 = vsel %vm1429_vm5, 1.0, %v4759_v25  ;;  %vm1410_vm10 = vmor %vm994_vm7, %vm3439_vm6  ;;  %vm1112_vm6 = vcmp.eq.f32.partialorder %v2972_v31, %v3004_v42  ;;  %vm995_vm7 = vcmp.gt.f32.partialorder %v266_v16, %v3004_v42  ;;  %vm1123_vm8 = vcmp.eq.f32.partialorder %v266_v16, %v3004_v42 }
 0x160   :  { %v1813_v17 = vpack.c.bf16 %v2511_v56, %v2511_v56  ;;  %v1809_v56 = vpack.c.bf16 %v2507_v30, %v2507_v30  ;;  %vm1276_vm0 = vmand %vm1116_vm15, %vm4828_vm1  ;;  %v2492_v62 = vsel %vm1410_vm10, 1.0, %v4759_v25  ;;  %v1806_v46 = vpack.c.bf16 %v2504_v10, %v2504_v10 }
 0x161   :  { %2662 = vset.pattern.permute.xlu2 %v2864_v9  ;;  %2661 = vset.pattern.permute.xlu1 %v2843_v2  ;;  %vm3538_vm4 = vmor %vm988_vm12, %vm1276_vm0  ;;  %v1807_v30 = vpack.c.bf16 %v2505_v39, %v2505_v39  ;;  %v2213_v8 = vpack.c.b16 %v2100_v37, %v2099_v63  ;;  %v1794_v10 = vpack.c.bf16 %v2492_v62, %v2492_v62 }
 0x162   :  { %v2102_v33 = vunpack.c.l.b16 %v1813_v17  ;;  %vm3547_vm5 = vmand %vm1117_vm9, %vm3511_vm13  ;;  %vm4837_vm12 = vnez %v4750_v7  ;;  %vm4847_vm11 = vcmp.gt.f32.partialorder %v2992_v38, %v3004_v42  ;;  %v4856_v35 = vpack.c.b16 %v3120_v52, %v3118_v50 }
 0x163   :  { %vm3555_vm15 = vmand %vm1114_vm2, %vm4833_vm3  ;;  %vm4836_vm2 = vnez %v4806_v20  ;;  %v2096_v62 = vunpack.c.l.b16 %v1807_v30  ;;  %v4850_v20 = vmov 0  ;;  %v4859_v50 = vpack.c.b16 %v3073_v60, %v3071_v59 }
 0x164   :  { %v2214_v17 = vpack.c.b16 %v2102_v33, %v2101_v43  ;;  %vm1283_vm9 = vmand %vm1123_vm8, %vm3410_vm14  ;;  %v2097_v43 = vunpack.c.l.b16 %v1808_v32  ;;  %v2098_v33 = vunpack.c.l.b16 %v1809_v56  ;;  %v2515_v39 = vsel %vm4836_vm2, 1.0, %v4759_v25 }
 0x165   :  { %vm1411_vm0 = vmor %vm995_vm7, %vm1283_vm9  ;;  %vm4840_vm9 = vnez %v4758_v1  ;;  %vm4841_vm2 = vcmp.eq.f32.partialorder %v2992_v38, %v3004_v42  ;;  %v2095_v32 = vunpack.c.l.b16 %v1806_v46  ;;  %v1817_v9 = vpack.c.bf16 %v2515_v39, %v2515_v39 }
 0x166   :  { %2340 = vmatpush.bf16.msra.mxu1 %v2214_v17  ;;  %vm3575_vm8 = vmand %vm1112_vm6, %vm4837_vm12  ;;  %v2493_v56 = vsel %vm1411_vm0, 1.0, %v4759_v25  ;;  %vm4844_vm6 = vcmp.gt.f32.partialorder %v3021_v45, %v3004_v42  ;;  %v2083_v46 = vunpack.c.l.b16 %v1794_v10  ;;  %v751_v45 = vpop.permute.xlu0 %750 }
 0x167   :  { %vm3587_vm10 = vmand %vm4841_vm2, %vm4840_vm9  ;;  %v1795_v63 = vpack.c.bf16 %v2493_v56, %v2493_v56  ;;  %vm1203_vm9 = vcmp.eq.f32.partialorder %v751_v45, %v3418_v5  ;;  %v2211_v10 = vpack.c.b16 %v2096_v62, %v2095_v32  ;;  %v3625_v56 = vunpack.c.l.b16 %v1817_v9 }
 0x168   :  { %vm3596_vm0 = vmor %vm4844_vm6, %vm3547_vm5  ;;  %vm986_vm5 = vcmp.gt.f32.partialorder %v2965_v29, %v3004_v42  ;;  %v2486_v9 = vsel %vm3538_vm4, 1.0, %v4759_v25 }
 0x169   :  { %502 = vperm.xlu2 %2662, %v2938_v22   ;;  %496 = vperm.xlu1 %2661, %v2938_v22   ;;  %v2084_v30 = vunpack.c.l.b16 %v1795_v63  ;;  %vm3613_vm1 = vmor %vm4847_vm11, %vm3587_vm10  ;;  %v2487_v39 = vsel %vm3596_vm0, 1.0, %v4759_v25  ;;  %vm984_vm11 = vcmp.gt.f32.partialorder %v2972_v31, %v3004_v42  ;;  %vm4853_vm0 = vcmp.eq.f32.partialorder %v2956_v24, %v3004_v42  ;;  %v3656_v63 = vpop.permute.xlu2 %411 }
 0x16a   :  { %2341 = vmatpush.bf16.msra.mxu1 %v2213_v8  ;;  %v2212_v8 = vpack.c.b16 %v2098_v33, %v2097_v43  ;;  %v1789_v32 = vpack.c.bf16 %v2487_v39, %v2487_v39  ;;  %vm1400_vm4 = vmor %vm984_vm11, %vm3575_vm8  ;;  %v2485_v55 = vsel %vm3613_vm1, 1.0, %v4759_v25  ;;  %v1788_v62 = vpack.c.bf16 %v2486_v9, %v2486_v9 }
 0x16b   :  { %v394_v17 = vpop.permute.xlu1 %393  ;;  %v2205_v33 = vpack.c.b16 %v2084_v30, %v2083_v46  ;;  %vm4857_vm8 = vnez %v4747_v34  ;;  %v1787_v16 = vpack.c.bf16 %v2485_v55, %v2485_v55 }
 0x16c   :  { %vm1016_vm7 = vcmp.gt.f32.partialorder %v394_v17, %v2987_v36  ;;  %vm1144_vm2 = vcmp.eq.f32.partialorder %v394_v17, %v2987_v36  ;;  %v2078_v37 = vunpack.c.l.b16 %v1789_v32  ;;  %v2077_v52 = vunpack.c.l.b16 %v1788_v62 }
 0x16d   :  { %vm1304_vm3 = vmand %vm1144_vm2, %vm4837_vm12  ;;  %vm1075_vm2 = vcmp.gt.f32.partialorder %v751_v45, %v3418_v5  ;;  %2328 = vmatpush.bf16.msra.mxu0 %v2205_v33  ;;  %v4862_v32 = vmov 0 }
 0x16e   :  { %vm1432_vm6 = vmor %vm1016_vm7, %vm1304_vm3  ;;  %2342 = vmatpush.bf16.msra.mxu1 %v2212_v8  ;;  %vm4852_vm7 = vnez %v4756_v61  ;;  %v2482_v8 = vsel %vm1400_vm4, 1.0, %v4759_v25  ;;  %v2202_v45 = vpack.c.b16 %v2078_v37, %v2077_v52  ;;  %vm4861_vm4 = vnez %v4743_v49 }
 0x16f   :  { %v2514_v43 = vsel %vm1432_vm6, 1.0, %v4759_v25  ;;  %vm1363_vm3 = vmand %vm1203_vm9, %vm3410_vm14  ;;  %v1784_v30 = vpack.c.bf16 %v2482_v8, %v2482_v8  ;;  %v2523_v17 = vsel %vm4861_vm4, 1.0, %v4759_v25 }
 0x170   :  { %v1816_v38 = vpack.c.bf16 %v2514_v43, %v2514_v43  ;;  %vm3630_vm10 = vmor %vm1075_vm2, %vm1363_vm3  ;;  %vm1110_vm2 = vcmp.eq.f32.partialorder %v3162_v26, %v3004_v42  ;;  %vm985_vm3 = vcmp.gt.f32.partialorder %v2956_v24, %v3004_v42  ;;  %v1825_v49 = vpack.c.bf16 %v2523_v17, %v2523_v17 }
 0x171   :  { %2665 = vset.pattern.permute.xlu2 %v2893_v15  ;;  %v4851_v20 = vsel %vm3630_vm10, 4294967295, %v4850_v20  ;;  %vm3639_vm6 = vmand %vm4853_vm0, %vm4852_vm7  ;;  %2664 = vset.pattern.permute.xlu1 %v2875_v11  ;;  %vm983_vm0 = vcmp.gt.f32.partialorder %v2962_v28, %v3004_v42  ;;  %vm4858_vm10 = vnez %v4721_v40  ;;  %v2073_v60 = vunpack.c.l.b16 %v1784_v30  ;;  %v4866_v30 = vld [vmem:[#allocation25_spill] sm:$0xff] }
 0x172   :  { %2343 = vmatpush.bf16.msra.mxu1 %v2211_v10  ;;  %v3647_v31 = vunpack.c.l.b16 %v1816_v38  ;;  %vm1402_vm9 = vmor %vm986_vm5, %vm3555_vm15  ;;  %vm1111_vm15 = vcmp.eq.f32.partialorder %v2962_v28, %v3004_v42  ;;  %2329 = vmatpush.bf16.msra.mxu0 %v4856_v35  ;;  %vm982_vm5 = vcmp.gt.f32.partialorder %v3162_v26, %v3004_v42  ;;  %v2076_v28 = vunpack.c.l.b16 %v1787_v16  ;;  %v4864_v35 = vld [vmem:[#allocation18_spill] sm:$0xff] }
 0x173   :  { %vm1270_vm11 = vmand %vm1110_vm2, %vm4857_vm8  ;;  %v2484_v24 = vsel %vm1402_vm9, 1.0, %v4759_v25  ;;  %v3690_v42 = vpop.permute.xlu2 %429 }
 0x174   :  { %v2216_v29 = vpack.c.b16 %v3625_v56, %v3647_v31  ;;  %vm1401_vm1 = vmor %vm985_vm3, %vm3639_vm6  ;;  %v1786_v26 = vpack.c.bf16 %v2484_v24, %v2484_v24  ;;  %v721_v33 = vpop.permute.xlu0 %720 }
 0x175   :  { %vm1271_vm7 = vmand %vm1111_vm15, %vm4858_vm10  ;;  %v2483_v46 = vsel %vm1401_vm1, 1.0, %v4759_v25  ;;  %vm1070_vm9 = vcmp.gt.f32.partialorder %v721_v33, %v3418_v5  ;;  %vm1198_vm2 = vcmp.eq.f32.partialorder %v721_v33, %v3418_v5 }
 0x176   :  { %vm1398_vm12 = vmor %vm982_vm5, %vm1270_vm11  ;;  %2330 = vmatpush.bf16.msra.mxu0 %v4859_v50  ;;  %v2075_v43 = vunpack.c.l.b16 %v1786_v26  ;;  %v1785_v59 = vpack.c.bf16 %v2483_v46, %v2483_v46  ;;  %vm4865_vm11 = vnez %v4735_v58  ;;  %v3714_v46 = vunpack.c.l.b16 %v1825_v49 }
 0x177   :  { %vm1399_vm6 = vmor %vm983_vm0, %vm1271_vm7  ;;  %v2480_v4 = vsel %vm1398_vm12, 1.0, %v4759_v25  ;;  %vm4860_vm7 = vnez %v4725_v44 }
 0x178   :  { %v2481_v39 = vsel %vm1399_vm6, 1.0, %v4759_v25  ;;  %v2201_v10 = vpack.c.b16 %v2076_v28, %v2075_v43  ;;  %v1782_v38 = vpack.c.bf16 %v2480_v4, %v2480_v4  ;;  %vm1358_vm3 = vmand %vm1198_vm2, %vm4860_vm7  ;;  %v2074_v9 = vunpack.c.l.b16 %v1785_v59 }
 0x179   :  { %520 = vperm.xlu2 %2665, %v2938_v22   ;;  %514 = vperm.xlu1 %2664, %v2938_v22   ;;  %vm3702_vm12 = vmor %vm1070_vm9, %vm1358_vm3  ;;  %v1783_v55 = vpack.c.bf16 %v2481_v39, %v2481_v39  ;;  %vm4867_vm6 = vnez %v4866_v30  ;;  %vm1132_vm3 = vcmp.eq.f32.partialorder %v3274_v14, %v3138_v23  ;;  %v4871_v30 = vld [vmem:[#allocation33_spill] sm:$0xff] }
 0x17a   :  { %2331 = vmatpush.bf16.msra.mxu0 %v2202_v45  ;;  %v4863_v32 = vsel %vm3702_vm12, 4294967295, %v4862_v32  ;;  %v2200_v24 = vpack.c.b16 %v2074_v9, %v2073_v60  ;;  %v2071_v37 = vunpack.c.l.b16 %v1782_v38  ;;  %v2518_v45 = vsel %vm4867_vm6, 1.0, %v4759_v25  ;;  %v4869_v38 = vld [vmem:[#allocation20_spill] sm:$0xff] }
 0x17b   :  { %v3707_v62 = vpop.permute.xlu1 %405  ;;  %v2072_v8 = vunpack.c.l.b16 %v1783_v55  ;;  %v1820_v60 = vpack.c.bf16 %v2518_v45, %v2518_v45  ;;  %v4872_v45 = vld [vmem:[#allocation31_spill] sm:$0xff]  ;;  %vm4879_vm12 = vnez %v4782_v12 }
 0x17c   :  { %v3725_v43 = vpop.permute.xlu0 %817 }
 0x17d   :  { %v2199_v50 = vpack.c.b16 %v2072_v8, %v2071_v37 }
 0x17e   :  { %2332 = vmatpush.bf16.msra.mxu0 %v2201_v10  ;;  %v3738_v10 = vunpack.c.l.b16 %v1820_v60 }
 0x181   :  { %2667 = vset.pattern.permute.xlu2 %v2908_v18  ;;  %2666 = vset.pattern.permute.xlu1 %v4864_v35 }
 0x182   :  { %2333 = vmatpush.bf16.msra.mxu0 %v2200_v24 }
 0x183   :  { %v442_v16 = vpop.permute.xlu2 %441 }
 0x184   :  { %vm1024_vm15 = vcmp.gt.f32.partialorder %v442_v16, %v2987_v36  ;;  %vm1152_vm5 = vcmp.eq.f32.partialorder %v442_v16, %v2987_v36 }
 0x185   :  { %vm1312_vm1 = vmand %vm1152_vm5, %vm4865_vm11  ;;  %vm1004_vm5 = vcmp.gt.f32.partialorder %v3274_v14, %v3138_v23 }
 0x186   :  { %vm1440_vm0 = vmor %vm1024_vm15, %vm1312_vm1  ;;  %2334 = vmatpush.bf16.msra.mxu0 %v2199_v50  ;;  %vm4868_vm1 = vnez %v4730_v54 }
 0x187   :  { %v2522_v52 = vsel %vm1440_vm0, 1.0, %v4759_v25  ;;  %vm1292_vm0 = vmand %vm1132_vm3, %vm4868_vm1 }
 0x188   :  { %v1824_v26 = vpack.c.bf16 %v2522_v52, %v2522_v52  ;;  %vm1420_vm6 = vmor %vm1004_vm5, %vm1292_vm0  ;;  %v4870_v52 = vpack.c.b16 %v3272_v57, %v3270_v6  ;;  %v4900_v6 = vld [vmem:[#allocation40_spill] sm:$0xff] }
 0x189   :  { %532 = vperm.xlu2 %2667, %v2938_v22   ;;  %526 = vperm.xlu1 %2666, %v2938_v22   ;;  %v2502_v55 = vsel %vm1420_vm6, 1.0, %v4759_v25  ;;  %vm4877_vm6 = vnez %v4741_v41 }
 0x18a   :  { %v3721_v28 = vunpack.c.l.b16 %v1824_v26  ;;  %v1804_v14 = vpack.c.bf16 %v2502_v55, %v2502_v55 }
 0x18b   :  { %v424_v4 = vpop.permute.xlu1 %423 }
 0x18c   :  { %vm1021_vm9 = vcmp.gt.f32.partialorder %v424_v4, %v2987_v36  ;;  %vm1149_vm2 = vcmp.eq.f32.partialorder %v424_v4, %v2987_v36  ;;  %v2220_v59 = vpack.c.b16 %v3714_v46, %v3721_v28  ;;  %v327_v24 = vpop.permute.xlu0 %326  ;;  %v2093_v49 = vunpack.c.l.b16 %v1804_v14  ;;  %v4883_v14 = vld [vmem:[#allocation22_spill] sm:$0xff] }
 0x18d   :  { %vm1309_vm4 = vmand %vm1149_vm2, %vm3511_vm13  ;;  %vm1133_vm2 = vcmp.eq.f32.partialorder %v327_v24, %v3138_v23  ;;  %v4873_v4 = vpack.c.b16 %v4871_v30, %v4872_v45 }
 0x18e   :  { %vm1437_vm15 = vmor %vm1021_vm9, %vm1309_vm4  ;;  %vm1005_vm9 = vcmp.gt.f32.partialorder %v327_v24, %v3138_v23 }
 0x18f   :  { %v2519_v33 = vsel %vm1437_vm15, 1.0, %v4759_v25  ;;  %vm1293_vm3 = vmand %vm1133_vm2, %vm3511_vm13 }
 0x190   :  { %v1821_v39 = vpack.c.bf16 %v2519_v33, %v2519_v33  ;;  %vm1421_vm4 = vmor %vm1005_vm9, %vm1293_vm3  ;;  %v4874_v33 = vld [vmem:[#allocation28_spill] sm:$0xff] }
 0x191   :  { %2670 = vset.pattern.permute.xlu2 %v2881_v13  ;;  %2669 = vset.pattern.permute.xlu1 %v4869_v38  ;;  %v2503_v37 = vsel %vm1421_vm4, 1.0, %v4759_v25 }
 0x192   :  { %v3742_v17 = vunpack.c.l.b16 %v1821_v39  ;;  %v1805_v16 = vpack.c.bf16 %v2503_v37, %v2503_v37  ;;  %v4875_v39 = vld [vmem:[#allocation29_spill] sm:$0xff] }
 0x193   :  { %v460_v23 = vpop.permute.xlu2 %459  ;;  %v4876_v55 = vpack.c.b16 %v4874_v33, %v4875_v39  ;;  %v4889_v33 = vld [vmem:[#allocation15_spill] sm:$0xff] }
 0x194   :  { %v2218_v9 = vpack.c.b16 %v3742_v17, %v3738_v10  ;;  %v2094_v8 = vunpack.c.l.b16 %v1805_v16  ;;  %vm1155_vm5 = vcmp.eq.f32.partialorder %v460_v23, %v2987_v36 }
 0x195   :  { %vm1315_vm3 = vmand %vm1155_vm5, %vm3410_vm14 }
 0x196   :  { %v2210_v50 = vpack.c.b16 %v2094_v8, %v2093_v49 }
 0x198   :  { %2344 = vmatpush.bf16.msra.mxu1 %v2210_v50 }
 0x199   :  { %550 = vperm.xlu2 %2670, %v2938_v22   ;;  %544 = vperm.xlu1 %2669, %v2938_v22  }
 0x19b   :  { %v436_v26 = vpop.permute.xlu1 %435 }
 0x19c   :  { %2345 = vmatpush.bf16.msra.mxu1 %v4870_v52 }
 0x1a0   :  { %2346 = vmatpush.bf16.msra.mxu1 %v4873_v4 }
 0x1a1   :  { %2672 = vset.pattern.permute.xlu2 %v2929_v21  ;;  %2671 = vset.pattern.permute.xlu1 %v3045_v51 }
 0x1a3   :  { %v472_v60 = vpop.permute.xlu2 %471 }
 0x1a4   :  { %2347 = vmatpush.bf16.msra.mxu1 %v4876_v55  ;;  %vm1157_vm15 = vcmp.eq.f32.partialorder %v472_v60, %v2987_v36  ;;  %vm1029_vm0 = vcmp.gt.f32.partialorder %v472_v60, %v2987_v36  ;;  %v4886_v60 = vld [vmem:[#allocation32_spill] sm:$0xff] }
 0x1a5   :  { %vm1317_vm9 = vmand %vm1157_vm15, %vm4877_vm6  ;;  %vm1027_vm15 = vcmp.gt.f32.partialorder %v460_v23, %v2987_v36  ;;  %vm4880_vm6 = vnez %v4750_v7 }
 0x1a6   :  { %vm1445_vm4 = vmor %vm1029_vm0, %vm1317_vm9  ;;  %vm1151_vm0 = vcmp.eq.f32.partialorder %v436_v26, %v2987_v36 }
 0x1a7   :  { %vm1443_vm5 = vmor %vm1027_vm15, %vm1315_vm3  ;;  %v2527_v37 = vsel %vm1445_vm4, 1.0, %v4759_v25  ;;  %vm1150_vm4 = vcmp.eq.f32.partialorder %v3690_v42, %v2987_v36 }
 0x1a8   :  { %v2525_v16 = vsel %vm1443_vm5, 1.0, %v4759_v25  ;;  %v1829_v50 = vpack.c.bf16 %v2527_v37, %v2527_v37  ;;  %vm1147_vm5 = vcmp.eq.f32.partialorder %v3656_v63, %v2987_v36 }
 0x1a9   :  { %562 = vperm.xlu2 %2672, %v2938_v22   ;;  %556 = vperm.xlu1 %2671, %v2938_v22   ;;  %v4878_v22 = vld [vmem:[#allocation14_spill] sm:$0xff]  ;;  %v1827_v30 = vpack.c.bf16 %v2525_v16, %v2525_v16 }
 0x1aa   :  { %v2118_v4 = vunpack.c.l.b16 %v1829_v50 }
 0x1ab   :  { %v454_v24 = vpop.permute.xlu1 %453 }
 0x1ac   :  { %vm1154_vm2 = vcmp.eq.f32.partialorder %v454_v24, %v2987_v36  ;;  %vm1026_vm10 = vcmp.gt.f32.partialorder %v454_v24, %v2987_v36 }
 0x1ad   :  { %vm1314_vm11 = vmand %vm1154_vm2, %vm4879_vm12 }
 0x1ae   :  { %vm1442_vm9 = vmor %vm1026_vm10, %vm1314_vm11  ;;  %vm1023_vm10 = vcmp.gt.f32.partialorder %v436_v26, %v2987_v36  ;;  %vm4885_vm11 = vnez %v4745_v0 }
 0x1af   :  { %v2524_v8 = vsel %vm1442_vm9, 1.0, %v4759_v25  ;;  %vm4887_vm9 = vnez %v4886_v60 }
 0x1b0   :  { %v1826_v52 = vpack.c.bf16 %v2524_v8, %v2524_v8  ;;  %v2533_v26 = vsel %vm4887_vm9, 1.0, %v4759_v25 }
 0x1b1   :  { %2674 = vset.pattern.permute.xlu2 %v2846_v3  ;;  %2673 = vset.pattern.permute.xlu1 %v4878_v22 }
 0x1b3   :  { %v491_v57 = vpop.permute.xlu2 %490 }
 0x1b4   :  { %vm1032_vm8 = vcmp.gt.f32.partialorder %v491_v57, %v3175_v53  ;;  %vm1160_vm1 = vcmp.eq.f32.partialorder %v491_v57, %v3175_v53  ;;  %v2116_v57 = vunpack.c.l.b16 %v1827_v30 }
 0x1b5   :  { %vm1320_vm13 = vmand %vm1160_vm1, %vm4880_vm6  ;;  %vm4884_vm1 = vnez %v4728_v47  ;;  %vm4888_vm6 = vnez %v4725_v44 }
 0x1b6   :  { %vm3785_vm7 = vmor %vm1032_vm8, %vm1320_vm13 }
 0x1b7   :  { %vm1311_vm2 = vmand %vm1151_vm0, %vm4884_vm1 }
 0x1b8   :  { %vm1439_vm0 = vmor %vm1023_vm10, %vm1311_vm2 }
 0x1b9   :  { %581 = vperm.xlu2 %2674, %v4883_v14   ;;  %575 = vperm.xlu1 %2673, %v4883_v14   ;;  %v2521_v24 = vsel %vm1439_vm0, 1.0, %v4759_v25  ;;  %vm1018_vm0 = vcmp.gt.f32.partialorder %v3707_v62, %v2987_v36 }
 0x1ba   :  { %v1823_v50 = vpack.c.bf16 %v2521_v24, %v2521_v24 }
 0x1bb   :  { %v466_v49 = vpop.permute.xlu1 %465 }
 0x1bc   :  { %vm1028_vm13 = vcmp.gt.f32.partialorder %v466_v49, %v2987_v36  ;;  %vm1156_vm8 = vcmp.eq.f32.partialorder %v466_v49, %v2987_v36  ;;  %v1835_v49 = vpack.c.bf16 %v2533_v26, %v2533_v26 }
 0x1bd   :  { %vm1316_vm3 = vmand %vm1156_vm8, %vm4885_vm11  ;;  %vm1022_vm8 = vcmp.gt.f32.partialorder %v3690_v42, %v2987_v36  ;;  %v2115_v42 = vunpack.c.l.b16 %v1826_v52 }
 0x1be   :  { %vm1444_vm15 = vmor %vm1028_vm13, %vm1316_vm3  ;;  %vm4890_vm3 = vnez %v4758_v1  ;;  %v3842_v30 = vunpack.c.l.b16 %v1835_v49 }
 0x1bf   :  { %v2526_v23 = vsel %vm1444_vm15, 1.0, %v4759_v25  ;;  %vm1310_vm13 = vmand %vm1150_vm4, %vm4888_vm6 }
 0x1c0   :  { %v1828_v45 = vpack.c.bf16 %v2526_v23, %v2526_v23  ;;  %vm3818_vm2 = vmand %vm1147_vm5, %vm4890_vm3  ;;  %vm1019_vm5 = vcmp.gt.f32.partialorder %v3656_v63, %v2987_v36  ;;  %vm4893_vm3 = vnez %v4766_v48  ;;  %v2221_v63 = vpack.c.b16 %v2116_v57, %v2115_v42 }
 0x1c1   :  { %2676 = vset.pattern.permute.xlu2 %v2843_v2  ;;  %2675 = vset.pattern.permute.xlu1 %v4889_v33  ;;  %vm1438_vm4 = vmor %vm1022_vm8, %vm1310_vm13  ;;  %vm4894_vm8 = vcmp.eq.f32.partialorder %v3707_v62, %v2987_v36 }
 0x1c2   :  { %v2117_v39 = vunpack.c.l.b16 %v1828_v45  ;;  %vm1306_vm13 = vmand %vm4894_vm8, %vm4893_vm3  ;;  %v2520_v8 = vsel %vm1438_vm4, 1.0, %v4759_v25  ;;  %v4895_v45 = vld [vmem:[#allocation30_spill] sm:$0xff]  ;;  %vm4897_vm4 = vnez %v4721_v40  ;;  %vm4899_vm8 = vnez %v4756_v61 }
 0x1c3   :  { %v503_v37 = vpop.permute.xlu2 %502  ;;  %vm1435_vm6 = vmor %vm1019_vm5, %vm3818_vm2  ;;  %v1822_v36 = vpack.c.bf16 %v2520_v8, %v2520_v8 }
 0x1c4   :  { %v2222_v16 = vpack.c.b16 %v2118_v4, %v2117_v39  ;;  %vm1034_vm15 = vcmp.gt.f32.partialorder %v503_v37, %v3175_v53  ;;  %vm1162_vm9 = vcmp.eq.f32.partialorder %v503_v37, %v3175_v53  ;;  %v2517_v60 = vsel %vm1435_vm6, 1.0, %v4759_v25 }
 0x1c5   :  { %vm1322_vm14 = vmand %vm1162_vm9, %vm4893_vm3  ;;  %v2112_v39 = vunpack.c.l.b16 %v1823_v50  ;;  %v2111_v57 = vunpack.c.l.b16 %v1822_v36 }
 0x1c6   :  { %2353 = vmatpush.bf16.msra.mxu2 %v2222_v16  ;;  %vm1450_vm10 = vmor %vm1034_vm15, %vm1322_vm14  ;;  %vm4896_vm14 = vnez %v4895_v45  ;;  %v1819_v16 = vpack.c.bf16 %v2517_v60, %v2517_v60  ;;  %v4901_v60 = vld [vmem:[#allocation41_spill] sm:$0xff] }
 0x1c7   :  { %v2532_v23 = vsel %vm1450_vm10, 1.0, %v4759_v25  ;;  %v2528_v4 = vsel %vm4896_vm14, 1.0, %v4759_v25  ;;  %vm1434_vm15 = vmor %vm1018_vm0, %vm1306_vm13  ;;  %v2219_v49 = vpack.c.b16 %v2112_v39, %v2111_v57 }
 0x1c8   :  { %v1834_v52 = vpack.c.bf16 %v2532_v23, %v2532_v23  ;;  %v1830_v24 = vpack.c.bf16 %v2528_v4, %v2528_v4  ;;  %v2516_v42 = vsel %vm1434_vm15, 1.0, %v4759_v25  ;;  %v2108_v4 = vunpack.c.l.b16 %v1819_v16  ;;  %v4904_v16 = vld [vmem:[#allocation42_spill] sm:$0xff] }
 0x1c9   :  { %593 = vperm.xlu2 %2676, %v4883_v14   ;;  %587 = vperm.xlu1 %2675, %v4883_v14   ;;  %v1818_v8 = vpack.c.bf16 %v2516_v42, %v2516_v42 }
 0x1ca   :  { %2354 = vmatpush.bf16.msra.mxu2 %v2221_v63  ;;  %v3849_v62 = vunpack.c.l.b16 %v1834_v52  ;;  %v3863_v23 = vunpack.c.l.b16 %v1830_v24  ;;  %v4898_v63 = vld [vmem:[#allocation17_spill] sm:$0xff] }
 0x1cb   :  { %v485_v26 = vpop.permute.xlu1 %484  ;;  %v2107_v45 = vunpack.c.l.b16 %v1818_v8 }
 0x1cc   :  { %vm1031_vm2 = vcmp.gt.f32.partialorder %v485_v26, %v3175_v53  ;;  %vm1159_vm10 = vcmp.eq.f32.partialorder %v485_v26, %v3175_v53  ;;  %v2225_v55 = vpack.c.b16 %v3842_v30, %v3849_v62  ;;  %v4902_v26 = vpack.c.b16 %v4900_v6, %v4901_v60 }
 0x1cd   :  { %vm1319_vm9 = vmand %vm1159_vm10, %vm4897_vm4  ;;  %v2217_v28 = vpack.c.b16 %v2108_v4, %v2107_v45  ;;  %v4702_v62 = vmov 0  }
 0x1ce   :  { %vm1447_vm5 = vmor %vm1031_vm2, %vm1319_vm9  ;;  %2355 = vmatpush.bf16.msra.mxu2 %v2220_v59  ;;  %v2530_v59 = vsel %vm3785_vm7, 1.0, %v4759_v25  ;;  %vm4905_vm7 = vnez %v4904_v16  ;;  %2723 = vset.pattern.permute.xlu0 %v4702_v62 }
 0x1cf   :  { %v2529_v37 = vsel %vm1447_vm5, 1.0, %v4759_v25  ;;  %v1832_v10 = vpack.c.bf16 %v2530_v59, %v2530_v59 }
 0x1d0   :  { %v1831_v50 = vpack.c.bf16 %v2529_v37, %v2529_v37 }
 0x1d1   :  { %2678 = vset.pattern.permute.xlu2 %v2875_v11  ;;  %2677 = vset.pattern.permute.xlu1 %v4898_v63  ;;  %v3892_v39 = vunpack.c.l.b16 %v1832_v10 }
 0x1d2   :  { %2356 = vmatpush.bf16.msra.mxu2 %v2219_v49  ;;  %v3867_v52 = vunpack.c.l.b16 %v1831_v50  ;;  %v2543_v49 = vsel %vm4905_vm7, 1.0, %v4759_v25 }
 0x1d3   :  { %v3900_v31 = vpop.permute.xlu2 %520  ;;  %v1845_v45 = vpack.c.bf16 %v2543_v49, %v2543_v49 }
 0x1d5   :  { %v2134_v59 = vunpack.c.l.b16 %v1845_v45  ;;  %v4910_v45 = vld [vmem:[#allocation21_spill] sm:$0xff] }
 0x1d6   :  { %2357 = vmatpush.bf16.msra.mxu2 %v2218_v9 }
 0x1d9   :  { %611 = vperm.xlu2 %2678, %v4883_v14   ;;  %605 = vperm.xlu1 %2677, %v4883_v14  }
 0x1da   :  { %2358 = vmatpush.bf16.msra.mxu2 %v2217_v28 }
 0x1db   :  { %v497_v36 = vpop.permute.xlu1 %496 }
 0x1dc   :  { %vm1033_vm6 = vcmp.gt.f32.partialorder %v497_v36, %v3175_v53  ;;  %vm1161_vm0 = vcmp.eq.f32.partialorder %v497_v36, %v3175_v53  ;;  %v4906_v36 = vld [vmem:[#allocation34_spill] sm:$0xff] }
 0x1dd   :  { %vm1321_vm13 = vmand %vm1161_vm0, %vm4899_vm8  ;;  %vm4907_vm5 = vnez %v4906_v36  ;;  %vm4921_vm8 = vnez %v4730_v54 }
 0x1de   :  { %vm1449_vm14 = vmor %vm1033_vm6, %vm1321_vm13  ;;  %2359 = vmatpush.bf16.msra.mxu2 %v2216_v29  ;;  %v4903_v29 = vld [vmem:[#allocation19_spill] sm:$0xff]  ;;  %v2538_v10 = vsel %vm4907_vm5, 1.0, %v4759_v25 }
 0x1df   :  { %v2531_v17 = vsel %vm1449_vm14, 1.0, %v4759_v25  ;;  %v1840_v60 = vpack.c.bf16 %v2538_v10, %v2538_v10 }
 0x1e0   :  { %v1833_v9 = vpack.c.bf16 %v2531_v17, %v2531_v17 }
 0x1e1   :  { %2680 = vset.pattern.permute.xlu2 %v4864_v35  ;;  %2679 = vset.pattern.permute.xlu1 %v2893_v15 }
 0x1e2   :  { %2360 = vmatpush.bf16.msra.mxu2 %v4902_v26  ;;  %v3894_v24 = vunpack.c.l.b16 %v1833_v9  ;;  %v4908_v26 = vld [vmem:[#allocation26_spill] sm:$0xff] }
 0x1e3   :  { %v533_v42 = vpop.permute.xlu2 %532  ;;  %vm4909_vm13 = vnez %v4908_v26 }
 0x1e9   :  { %623 = vperm.xlu2 %2680, %v4883_v14   ;;  %617 = vperm.xlu1 %2679, %v4883_v14  }
 0x1eb   :  { %v3906_v37 = vpop.permute.xlu1 %514 }
 0x1f1   :  { %2683 = vset.pattern.permute.xlu2 %v4869_v38  ;;  %2682 = vset.pattern.permute.xlu1 %v4903_v29 }
 0x1f3   :  { %v551_v57 = vpop.permute.xlu2 %550 }
 0x1f9   :  { %641 = vperm.xlu2 %2683, %v4883_v14   ;;  %635 = vperm.xlu1 %2682, %v4883_v14  }
 0x1fb   :  { %v527_v50 = vpop.permute.xlu1 %526 }
 0x201   :  { %2685 = vset.pattern.permute.xlu2 %v3045_v51  ;;  %2684 = vset.pattern.permute.xlu1 %v2881_v13 }
 0x203   :  { %v563_v8 = vpop.permute.xlu2 %562 }
 0x204   :  { %vm1044_vm15 = vcmp.gt.f32.partialorder %v563_v8, %v3175_v53  ;;  %vm1172_vm2 = vcmp.eq.f32.partialorder %v563_v8, %v3175_v53  ;;  %v2129_v8 = vunpack.c.l.b16 %v1840_v60 }
 0x205   :  { %vm1332_vm10 = vmand %vm1172_vm2, %vm4885_vm11  ;;  %vm1165_vm2 = vcmp.eq.f32.partialorder %v3900_v31, %v3175_v53  ;;  %vm4914_vm11 = vnez %v4827_v27 }
 0x206   :  { %vm1460_vm9 = vmor %vm1044_vm15, %vm1332_vm10  ;;  %vm1170_vm15 = vcmp.eq.f32.partialorder %v551_v57, %v3175_v53 }
 0x207   :  { %v2542_v4 = vsel %vm1460_vm9, 1.0, %v4759_v25  ;;  %vm1330_vm10 = vmand %vm1170_vm15, %vm4879_vm12  ;;  %vm1166_vm15 = vcmp.eq.f32.partialorder %v527_v50, %v3175_v53  ;;  %vm1039_vm12 = vcmp.gt.f32.partialorder %v533_v42, %v3175_v53 }
 0x208   :  { %v1844_v28 = vpack.c.bf16 %v2542_v4, %v2542_v4  ;;  %vm3947_vm3 = vmand %vm1165_vm2, %vm4914_vm11  ;;  %vm4918_vm2 = vnez %v4725_v44 }
 0x209   :  { %653 = vperm.xlu2 %2685, %v4883_v14   ;;  %647 = vperm.xlu1 %2684, %v4883_v14   ;;  %vm1326_vm11 = vmand %vm1166_vm15, %vm4918_vm2 }
 0x20a   :  { %v2133_v17 = vunpack.c.l.b16 %v1844_v28 }
 0x20b   :  { %v545_v9 = vpop.permute.xlu1 %544 }
 0x20c   :  { %v2230_v6 = vpack.c.b16 %v2134_v59, %v2133_v17  ;;  %vm1041_vm6 = vcmp.gt.f32.partialorder %v545_v9, %v3175_v53  ;;  %vm1169_vm0 = vcmp.eq.f32.partialorder %v545_v9, %v3175_v53  ;;  %v4911_v59 = vld [vmem:[#allocation35_spill] sm:$0xff] }
 0x20d   :  { %vm1329_vm14 = vmand %vm1169_vm0, %vm4909_vm13 }
 0x20e   :  { %2366 = vmatpush.bf16.msra.mxu3 %v2230_v6  ;;  %vm1457_vm7 = vmor %vm1041_vm6, %vm1329_vm14  ;;  %vm1167_vm6 = vcmp.eq.f32.partialorder %v533_v42, %v3175_v53  ;;  %vm1042_vm14 = vcmp.gt.f32.partialorder %v551_v57, %v3175_v53  ;;  %v4917_v57 = vld [vmem:[#allocation27_spill] sm:$0xff] }
 0x20f   :  { %v2539_v16 = vsel %vm1457_vm7, 1.0, %v4759_v25 }
 0x210   :  { %v1841_v49 = vpack.c.bf16 %v2539_v16, %v2539_v16 }
 0x211   :  { %2688 = vset.pattern.permute.xlu2 %v4878_v22  ;;  %2687 = vset.pattern.permute.xlu1 %v4910_v45 }
 0x212   :  { %v2130_v28 = vunpack.c.l.b16 %v1841_v49 }
 0x213   :  { %v582_v4 = vpop.permute.xlu2 %581 }
 0x214   :  { %vm1047_vm9 = vcmp.gt.f32.partialorder %v582_v4, %v4911_v59  ;;  %vm1175_vm5 = vcmp.eq.f32.partialorder %v582_v4, %v4911_v59  ;;  %v2228_v36 = vpack.c.b16 %v2130_v28, %v2129_v8 }
 0x215   :  { %vm1335_vm0 = vmand %vm1175_vm5, %vm4897_vm4  ;;  %vm1164_vm4 = vcmp.eq.f32.partialorder %v3906_v37, %v3175_v53 }
 0x216   :  { %vm3941_vm7 = vmor %vm1047_vm9, %vm1335_vm0  ;;  %vm1038_vm0 = vcmp.gt.f32.partialorder %v527_v50, %v3175_v53 }
 0x217   :  { %vm1327_vm5 = vmand %vm1167_vm6, %vm4884_vm1 }
 0x218   :  { %vm1458_vm9 = vmor %vm1042_vm14, %vm1330_vm10 }
 0x219   :  { %672 = vperm.xlu2 %2688, %v4917_v57   ;;  %665 = vperm.xlu1 %2687, %v4883_v14   ;;  %vm3962_vm13 = vmor %vm1039_vm12, %vm1327_vm5  ;;  %v2540_v6 = vsel %vm1458_vm9, 1.0, %v4759_v25  ;;  %vm1037_vm12 = vcmp.gt.f32.partialorder %v3900_v31, %v3175_v53  ;;  %vm4924_vm5 = vnez %v4801_v19 }
 0x21a   :  { %vm3968_vm6 = vmand %vm1164_vm4, %vm4921_vm8  ;;  %vm1036_vm4 = vcmp.gt.f32.partialorder %v3906_v37, %v3175_v53  ;;  %v1842_v14 = vpack.c.bf16 %v2540_v6, %v2540_v6  ;;  %v2537_v31 = vsel %vm3962_vm13, 1.0, %v4759_v25 }
 0x21b   :  { %v557_v60 = vpop.permute.xlu1 %556  ;;  %vm1454_vm10 = vmor %vm1038_vm0, %vm1326_vm11  ;;  %v1839_v6 = vpack.c.bf16 %v2537_v31, %v2537_v31 }
 0x21c   :  { %vm1043_vm14 = vcmp.gt.f32.partialorder %v557_v60, %v3175_v53  ;;  %vm1171_vm15 = vcmp.eq.f32.partialorder %v557_v60, %v3175_v53  ;;  %vm1453_vm11 = vmor %vm1037_vm12, %vm3947_vm3  ;;  %v2536_v49 = vsel %vm1454_vm10, 1.0, %v4759_v25  ;;  %v2131_v53 = vunpack.c.l.b16 %v1842_v14 }
 0x21d   :  { %vm1331_vm1 = vmand %vm1171_vm15, %vm4924_vm5  ;;  %v2535_v8 = vsel %vm1453_vm11, 1.0, %v4759_v25  ;;  %v1838_v17 = vpack.c.bf16 %v2536_v49, %v2536_v49  ;;  %v2545_v14 = vsel %vm3941_vm7, 1.0, %v4759_v25  ;;  %vm4927_vm10 = vnez %v4756_v61 }
 0x21e   :  { %vm1459_vm8 = vmor %vm1043_vm14, %vm1331_vm1  ;;  %v1837_v60 = vpack.c.bf16 %v2535_v8, %v2535_v8  ;;  %v1847_v49 = vpack.c.bf16 %v2545_v14, %v2545_v14  ;;  %vm4929_vm11 = vnez %v4750_v7 }
 0x21f   :  { %v2541_v50 = vsel %vm1459_vm8, 1.0, %v4759_v25  ;;  %vm1452_vm9 = vmor %vm1036_vm4, %vm3968_vm6  ;;  %v2127_v9 = vunpack.c.l.b16 %v1838_v17  ;;  %vm4925_vm8 = vnez %v4747_v34 }
 0x220   :  { %v1843_v16 = vpack.c.bf16 %v2541_v50, %v2541_v50  ;;  %v2534_v4 = vsel %vm1452_vm9, 1.0, %v4759_v25  ;;  %v2128_v50 = vunpack.c.l.b16 %v1839_v6  ;;  %v2126_v56 = vunpack.c.l.b16 %v1837_v60  ;;  %v2438_v6 = vld [vmem:[#allocation3] sm:$0xff] }
 0x221   :  { %2690 = vset.pattern.permute.xlu2 %v4889_v33  ;;  %2689 = vset.pattern.permute.xlu1 %v2846_v3  ;;  %v1836_v42 = vpack.c.bf16 %v2534_v4, %v2534_v4  ;;  %v4006_v8 = vunpack.c.l.b16 %v1847_v49  ;;  %v4926_v4 = vld [vmem:[#allocation16_spill] sm:$0xff] }
 0x222   :  { %v2132_v37 = vunpack.c.l.b16 %v1843_v16  ;;  %v2227_v31 = vpack.c.b16 %v2128_v50, %v2127_v9  ;;  %v4928_v9 = vpack.c.b16 %v3894_v24, %v3892_v39  ;;  %v4930_v39 = vpack.c.b16 %v3867_v52, %v3863_v23 }
 0x223   :  { %v2125_v46 = vunpack.c.l.b16 %v1836_v42 }
 0x224   :  { %v2229_v28 = vpack.c.b16 %v2132_v37, %v2131_v53  ;;  %v594_v53 = vpop.permute.xlu2 %593 }
 0x225   :  { %vm1177_vm7 = vcmp.eq.f32.partialorder %v594_v53, %v4911_v59  ;;  %vm1049_vm6 = vcmp.gt.f32.partialorder %v594_v53, %v4911_v59 }
 0x226   :  { %2367 = vmatpush.bf16.msra.mxu3 %v2229_v28  ;;  %vm1337_vm14 = vmand %vm1177_vm7, %vm4927_vm10 }
 0x227   :  { %vm1465_vm15 = vmor %vm1049_vm6, %vm1337_vm14 }
 0x228   :  { %v2547_v42 = vsel %vm1465_vm15, 1.0, %v4759_v25 }
 0x229   :  { %684 = vperm.xlu2 %2690, %v4917_v57   ;;  %678 = vperm.xlu1 %2689, %v4917_v57   ;;  %v1849_v14 = vpack.c.bf16 %v2547_v42, %v2547_v42 }
 0x22a   :  { %2368 = vmatpush.bf16.msra.mxu3 %v2228_v36  ;;  %v2226_v36 = vpack.c.b16 %v2126_v56, %v2125_v46  ;;  %v2436_v46 = vld [vmem:[%s4613_s3] sm:$0xff] }
 0x22b   :  { %v576_v16 = vpop.permute.xlu1 %575  ;;  %v2437_v56 = vcvt.s32.f32 %v2436_v46  ;;  %v4043_v53 = vunpack.c.l.b16 %v1849_v14 }
 0x22c   :  { %vm1046_vm1 = vcmp.gt.f32.partialorder %v576_v16, %v4911_v59  ;;  %vm1174_vm3 = vcmp.eq.f32.partialorder %v576_v16, %v4911_v59  ;;  %v4931_v16 = vld [vmem:[#allocation36_spill] sm:$0xff] }
 0x22d   :  { %vm1334_vm13 = vmand %vm1174_vm3, %vm4925_vm8  ;;  %v2439_v60 = vmin.f32 %v2437_v56, %v2438_v6  ;;  %vm4932_vm3 = vnez %v4931_v16 }
 0x22e   :  { %vm1462_vm0 = vmor %vm1046_vm1, %vm1334_vm13  ;;  %2369 = vmatpush.bf16.msra.mxu3 %v2227_v31  ;;  %v2553_v31 = vsel %vm4932_vm3, 1.0, %v4759_v25 }
 0x22f   :  { %v2544_v37 = vsel %vm1462_vm0, 1.0, %v4759_v25  ;;  %v2440_v50 = vmax.f32 %v2439_v60, 1.0  ;;  %v1855_v23 = vpack.c.bf16 %v2553_v31, %v2553_v31  ;;  %v4067_v60 = vpop.permute.xlu0 %811 }
 0x230   :  { %v1846_v10 = vpack.c.bf16 %v2544_v37, %v2544_v37 }
 0x231   :  { %2692 = vset.pattern.permute.xlu2 %v4898_v63  ;;  %2691 = vset.pattern.permute.xlu1 %v4926_v4  ;;  %v4055_v56 = vunpack.c.l.b16 %v1855_v23 }
 0x232   :  { %2370 = vmatpush.bf16.msra.mxu3 %v2226_v36  ;;  %v4009_v28 = vunpack.c.l.b16 %v1846_v10  ;;  %2444 = vperm.xlu0 %2723, %v2440_v50  }
 0x233   :  { %v4028_v30 = vpop.permute.xlu2 %611 }
 0x236   :  { %2371 = vmatpush.bf16.msra.mxu3 %v2225_v55 }
 0x237   :  { %v4074_v50 = vpop.permute.xlu0 %599 }
 0x239   :  { %702 = vperm.xlu2 %2692, %v4917_v57   ;;  %696 = vperm.xlu1 %2691, %v4917_v57  }
 0x23a   :  { %2372 = vmatpush.bf16.msra.mxu3 %v4928_v9 }
 0x23b   :  { %v588_v55 = vpop.permute.xlu1 %587 }
 0x23c   :  { %vm1048_vm12 = vcmp.gt.f32.partialorder %v588_v55, %v4911_v59  ;;  %vm1176_vm4 = vcmp.eq.f32.partialorder %v588_v55, %v4911_v59 }
 0x23d   :  { %vm1336_vm9 = vmand %vm1176_vm4, %vm4929_vm11 }
 0x23e   :  { %vm1464_vm1 = vmor %vm1048_vm12, %vm1336_vm9  ;;  %2373 = vmatpush.bf16.msra.mxu3 %v4930_v39 }
 0x23f   :  { %v2546_v24 = vsel %vm1464_vm1, 1.0, %v4759_v25 }
 0x240   :  { %v1848_v49 = vpack.c.bf16 %v2546_v24, %v2546_v24  ;;  %v4081_v24 = vpop.permute.xlu0 %890 }
 0x241   :  { %2694 = vset.pattern.permute.xlu2 %v2893_v15  ;;  %2693 = vset.pattern.permute.xlu1 %v2875_v11 }
 0x242   :  { %v4046_v36 = vunpack.c.l.b16 %v1848_v49  ;;  %v4935_v49 = vld [vmem:[#allocation38_spill] sm:$0xff] }
 0x243   :  { %v624_v37 = vpop.permute.xlu2 %623 }
 0x244   :  { %vm1054_vm13 = vcmp.gt.f32.partialorder %v624_v37, %v4911_v59  ;;  %vm1182_vm0 = vcmp.eq.f32.partialorder %v624_v37, %v4911_v59  ;;  %v4936_v37 = vld [vmem:[#allocation24_spill] sm:$0xff] }
 0x245   :  { %vm1342_vm7 = vmand %vm1182_vm0, %vm4918_vm2  ;;  %vm4942_vm2 = vnez %v4782_v12 }
 0x246   :  { %vm1470_vm6 = vmor %vm1054_vm13, %vm1342_vm7 }
 0x247   :  { %v2552_v10 = vsel %vm1470_vm6, 1.0, %v4759_v25 }
 0x248   :  { %v1854_v46 = vpack.c.bf16 %v2552_v10, %v2552_v10 }
 0x249   :  { %714 = vperm.xlu2 %2694, %v4917_v57   ;;  %708 = vperm.xlu1 %2693, %v4917_v57  }
 0x24a   :  { %v4059_v6 = vunpack.c.l.b16 %v1854_v46 }
 0x24b   :  { %v4072_v55 = vpop.permute.xlu1 %605 }
 0x24c   :  { %v2235_v42 = vpack.c.b16 %v4055_v56, %v4059_v6  ;;  %v4958_v6 = vpack.c.b16 %v4006_v8, %v4009_v28 }
 0x251   :  { %2696 = vset.pattern.permute.xlu2 %v4903_v29  ;;  %2695 = vset.pattern.permute.xlu1 %v2908_v18 }
 0x253   :  { %v642_v9 = vpop.permute.xlu2 %641 }
 0x254   :  { %vm1185_vm7 = vcmp.eq.f32.partialorder %v642_v9, %v4911_v59 }
 0x259   :  { %732 = vperm.xlu2 %2696, %v4917_v57   ;;  %726 = vperm.xlu1 %2695, %v4917_v57  }
 0x25b   :  { %v4078_v39 = vpop.permute.xlu1 %617 }
 0x261   :  { %2698 = vset.pattern.permute.xlu2 %v2881_v13  ;;  %2697 = vset.pattern.permute.xlu1 %v4869_v38 }
 0x263   :  { %v654_v14 = vpop.permute.xlu2 %653 }
 0x264   :  { %vm1187_vm0 = vcmp.eq.f32.partialorder %v654_v14, %v4911_v59 }
 0x265   :  { %vm4104_vm6 = vmand %vm1187_vm0, %vm4924_vm5 }
 0x269   :  { %744 = vperm.xlu2 %2698, %v4917_v57   ;;  %738 = vperm.xlu1 %2697, %v4917_v57  }
 0x271   :  { %2701 = vset.pattern.permute.xlu2 %v2929_v21  ;;  %2700 = vset.pattern.permute.xlu1 %v4910_v45  ;;  %v636_v21 = vpop.permute.xlu1 %635  ;;  %v691_v45 = vpop.permute.xlu0 %690 }
 0x272   :  { %vm1065_vm9 = vcmp.gt.f32.partialorder %v691_v45, %v3418_v5  ;;  %vm1193_vm1 = vcmp.eq.f32.partialorder %v691_v45, %v3418_v5  ;;  %vm1184_vm0 = vcmp.eq.f32.partialorder %v636_v21, %v4911_v59 }
 0x273   :  { %v673_v16 = vpop.permute.xlu2 %672  ;;  %vm1353_vm3 = vmand %vm1193_vm1, %vm4927_vm10  ;;  %vm1059_vm1 = vcmp.gt.f32.partialorder %v654_v14, %v4911_v59  ;;  %v4943_v14 = vld [vmem:[#allocation37_spill] sm:$0xff] }
 0x274   :  { %vm1062_vm14 = vcmp.gt.f32.partialorder %v673_v16, %v3418_v5  ;;  %vm1190_vm15 = vcmp.eq.f32.partialorder %v673_v16, %v3418_v5  ;;  %vm1481_vm13 = vmor %vm1065_vm9, %vm1353_vm3 }
 0x275   :  { %vm1350_vm12 = vmand %vm1190_vm15, %vm4925_vm8  ;;  %v2563_v23 = vsel %vm1481_vm13, 1.0, %v4759_v25  ;;  %vm4939_vm13 = vnez %v4908_v26 }
 0x276   :  { %vm4087_vm4 = vmor %vm1062_vm14, %vm1350_vm12  ;;  %v1865_v45 = vpack.c.bf16 %v2563_v23, %v2563_v23 }
 0x277   :  { %vm4116_vm8 = vmand %vm1185_vm7, %vm4939_vm13 }
 0x278   :  { %vm1475_vm7 = vmor %vm1059_vm1, %vm4104_vm6 }
 0x279   :  { %950 = vperm.xlu2 %2701, %v4935_v49   ;;  %859 = vperm.xlu1 %2700, %v4936_v37  }
 0x27b   :  { %v648_v10 = vpop.permute.xlu1 %647 }
 0x27c   :  { %vm1186_vm12 = vcmp.eq.f32.partialorder %v648_v10, %v4911_v59  ;;  %vm1058_vm10 = vcmp.gt.f32.partialorder %v648_v10, %v4911_v59 }
 0x27d   :  { %vm1346_vm5 = vmand %vm1186_vm12, %vm4942_vm2 }
 0x27e   :  { %vm1474_vm12 = vmor %vm1058_vm10, %vm1346_vm5  ;;  %vm4948_vm5 = vnez %v4741_v41 }
 0x27f   :  { %v2556_v16 = vsel %vm1474_vm12, 1.0, %v4759_v25 }
 0x281   :  { %756 = vperm.xlu2 %2701, %v4917_v57   ;;  %956 = vperm.xlu1 %2700, %v4935_v49  }
 0x283   :  { %v685_v46 = vpop.permute.xlu2 %684 }
 0x284   :  { %vm1064_vm14 = vcmp.gt.f32.partialorder %v685_v46, %v3418_v5  ;;  %vm1192_vm15 = vcmp.eq.f32.partialorder %v685_v46, %v3418_v5  ;;  %v4125_v46 = vunpack.c.l.b16 %v1865_v45 }
 0x285   :  { %vm1352_vm9 = vmand %vm1192_vm15, %vm4929_vm11  ;;  %vm4944_vm15 = vnez %v4943_v14 }
 0x286   :  { %vm1480_vm3 = vmor %vm1064_vm14, %vm1352_vm9  ;;  %vm1057_vm14 = vcmp.gt.f32.partialorder %v642_v9, %v4911_v59  ;;  %v2558_v17 = vsel %vm4944_vm15, 1.0, %v4759_v25  ;;  %vm1056_vm9 = vcmp.gt.f32.partialorder %v636_v21, %v4911_v59  ;;  %vm1053_vm15 = vcmp.gt.f32.partialorder %v4078_v39, %v4911_v59 }
 0x287   :  { %v2562_v62 = vsel %vm1480_vm3, 1.0, %v4759_v25  ;;  %vm4945_vm3 = vnez %v4735_v58  ;;  %vm1473_vm13 = vmor %vm1057_vm14, %vm4116_vm8  ;;  %v1860_v21 = vpack.c.bf16 %v2558_v17, %v2558_v17  ;;  %vm1181_vm14 = vcmp.eq.f32.partialorder %v4078_v39, %v4911_v59 }
 0x288   :  { %v1864_v23 = vpack.c.bf16 %v2562_v62, %v2562_v62  ;;  %vm1344_vm11 = vmand %vm1184_vm0, %vm4945_vm3  ;;  %v2555_v45 = vsel %vm1473_vm13, 1.0, %v4759_v25  ;;  %vm1180_vm13 = vcmp.eq.f32.partialorder %v4028_v30, %v4911_v59 }
 0x289   :  { %2704 = vset.pattern.permute.xlu2 %v3045_v51  ;;  %2703 = vset.pattern.permute.xlu1 %v2881_v13  ;;  %vm4144_vm6 = vmor %vm1056_vm9, %vm1344_vm11  ;;  %v2557_v13 = vsel %vm1475_vm7, 1.0, %v4759_v25  ;;  %v2149_v14 = vunpack.c.l.b16 %v1860_v21  ;;  %v1858_v51 = vpack.c.bf16 %v2556_v16, %v2556_v16  ;;  %vm1178_vm11 = vcmp.eq.f32.partialorder %v4074_v50, %v4911_v59 }
 0x28a   :  { %v4138_v62 = vunpack.c.l.b16 %v1864_v23  ;;  %v2554_v17 = vsel %vm4144_vm6, 1.0, %v4759_v25  ;;  %vm4949_vm9 = vnez %v4827_v27  ;;  %v1857_v10 = vpack.c.bf16 %v2555_v45, %v2555_v45 }
 0x28b   :  { %v666_v9 = vpop.permute.xlu1 %665  ;;  %vm1341_vm12 = vmand %vm1181_vm14, %vm4949_vm9  ;;  %vm4950_vm6 = vnez %v4766_v48  ;;  %v2147_v16 = vunpack.c.l.b16 %v1858_v51  ;;  %vm1050_vm14 = vcmp.gt.f32.partialorder %v4074_v50, %v4911_v59 }
 0x28c   :  { %vm1061_vm1 = vcmp.gt.f32.partialorder %v666_v9, %v4911_v59  ;;  %vm1189_vm0 = vcmp.eq.f32.partialorder %v666_v9, %v4911_v59  ;;  %v1859_v9 = vpack.c.bf16 %v2557_v13, %v2557_v13  ;;  %vm1469_vm7 = vmor %vm1053_vm15, %vm1341_vm12  ;;  %v2146_v39 = vunpack.c.l.b16 %v1857_v10 }
 0x28d   :  { %vm1349_vm8 = vmand %vm1189_vm0, %vm4948_vm5  ;;  %vm1052_vm0 = vcmp.gt.f32.partialorder %v4028_v30, %v4911_v59  ;;  %vm4954_vm5 = vnez %v4758_v1  ;;  %v2551_v50 = vsel %vm1469_vm7, 1.0, %v4759_v25  ;;  %vm4956_vm7 = vnez %v4721_v40 }
 0x28e   :  { %vm1477_vm10 = vmor %vm1061_vm1, %vm1349_vm8  ;;  %vm4953_vm8 = vnez %v4730_v54 }
 0x28f   :  { %v2559_v57 = vsel %vm1477_vm10, 1.0, %v4759_v25  ;;  %vm4178_vm1 = vmand %vm1178_vm11, %vm4950_vm6  ;;  %vm1051_vm11 = vcmp.gt.f32.partialorder %v4072_v55, %v4911_v59  ;;  %vm4955_vm6 = vcmp.eq.f32.partialorder %v4072_v55, %v4911_v59  ;;  %v2560_v59 = vsel %vm4087_vm4, 1.0, %v4759_v25 }
 0x290   :  { %v1861_v23 = vpack.c.bf16 %v2559_v57, %v2559_v57  ;;  %v2148_v57 = vunpack.c.l.b16 %v1859_v9  ;;  %vm1340_vm10 = vmand %vm1180_vm13, %vm4953_vm8  ;;  %v1862_v21 = vpack.c.bf16 %v2560_v59, %v2560_v59  ;;  %vm4959_vm4 = vnez %v4851_v20 }
 0x291   :  { %847 = vperm.xlu2 %2704, %v4936_v37   ;;  %841 = vperm.xlu1 %2703, %v4936_v37   ;;  %vm1339_vm9 = vmand %vm4955_vm6, %vm4954_vm5 }
 0x292   :  { %v2150_v52 = vunpack.c.l.b16 %v1861_v23  ;;  %v1856_v23 = vpack.c.bf16 %v2554_v17, %v2554_v17  ;;  %vm1468_vm3 = vmor %vm1052_vm0, %vm1340_vm10 }
 0x293   :  { %vm1466_vm13 = vmor %vm1050_vm14, %vm4178_vm1  ;;  %v2550_v51 = vsel %vm1468_vm3, 1.0, %v4759_v25 }
 0x294   :  { %v2238_v13 = vpack.c.b16 %v2150_v52, %v2149_v14  ;;  %v2237_v52 = vpack.c.b16 %v2148_v57, %v2147_v16  ;;  %v2145_v30 = vunpack.c.l.b16 %v1856_v23  ;;  %vm1467_vm15 = vmor %vm1051_vm11, %vm1339_vm9  ;;  %v1853_v14 = vpack.c.bf16 %v2551_v50, %v2551_v50 }
 0x295   :  { %v2549_v9 = vsel %vm1467_vm15, 1.0, %v4759_v25  ;;  %v2548_v17 = vsel %vm1466_vm13, 1.0, %v4759_v25  ;;  %v1852_v10 = vpack.c.bf16 %v2550_v51, %v2550_v51  ;;  %vm4960_vm11 = vnez %v4863_v32  ;;  %v2724_v32 = vld [vmem:[%s4610_s0] sm:$0xff]  ;;  %s2807_s0 = smov [#allocation10]  }
 0x296   :  { %2379 = vmatpush.bf16.msrb.mxu0 %v2238_v13  ;;  %v2236_v45 = vpack.c.b16 %v2146_v39, %v2145_v30  ;;  %v2142_v13 = vunpack.c.l.b16 %v1853_v14  ;;  %v1850_v16 = vpack.c.bf16 %v2548_v17, %v2548_v17  ;;  %v1851_v57 = vpack.c.bf16 %v2549_v9, %v2549_v9  ;;  %s2458_s28 = sshll.u32 %s2807_s0, 4  ;;  %s2459_s28 = int_to_ptr.vmem [resolvable:$true] %s2458_s28 }
 0x297   :  { %v4216_v30 = vunpack.c.l.b16 %v1862_v21  ;;  %v2568_v28 = vsel %vm4960_vm11, 1.0, %v4759_v25  ;;  %vm4966_vm11 = vnez %v4745_v0 }
 0x298   :  { %v2139_v51 = vunpack.c.l.b16 %v1850_v16  ;;  %v2140_v59 = vunpack.c.l.b16 %v1851_v57 }
 0x299   :  { %944 = vperm.xlu2 %2704, %v4935_v49   ;;  %938 = vperm.xlu1 %2703, %v4935_v49  }
 0x29a   :  { %2380 = vmatpush.bf16.msrb.mxu0 %v2237_v52  ;;  %v2141_v52 = vunpack.c.l.b16 %v1852_v10 }
 0x29b   :  { %v679_v55 = vpop.permute.xlu1 %678 }
 0x29c   :  { %vm1063_vm12 = vcmp.gt.f32.partialorder %v679_v55, %v3418_v5  ;;  %vm1191_vm6 = vcmp.eq.f32.partialorder %v679_v55, %v3418_v5  ;;  %v2234_v50 = vpack.c.b16 %v2142_v13, %v2141_v52  ;;  %v964_v13 = vrot.slane %v2724_v32, 6 }
 0x29d   :  { %vm1351_vm9 = vmand %vm1191_vm6, %vm4956_vm7 }
 0x29e   :  { %vm1479_vm1 = vmor %vm1063_vm12, %vm1351_vm9  ;;  %2381 = vmatpush.bf16.msrb.mxu0 %v2236_v45  ;;  %v2233_v45 = vpack.c.b16 %v2140_v59, %v2139_v51  ;;  %vm4961_vm12 = vnez %v4728_v47  ;;  %v4279_v51 = vperm.slane %v964_v13, 0 }
 0x29f   :  { %v2561_v31 = vsel %vm1479_vm1, 1.0, %v4759_v25 }
 0x2a0   :  { %v1863_v23 = vpack.c.bf16 %v2561_v31, %v2561_v31  ;;  %v1870_v31 = vpack.c.bf16 %v2568_v28, %v2568_v28 }
 0x2a1   :  { %2707 = vset.pattern.permute.xlu2 %v4869_v38  ;;  %2706 = vset.pattern.permute.xlu1 %v4903_v29  ;;  %v4222_v38 = vpop.permute.xlu2 %702  ;;  %v4957_v29 = vpack.c.b16 %v4043_v53, %v4046_v36  ;;  %v2573_v53 = vsel %vm4959_vm4, 1.0, %v4759_v25 }
 0x2a2   :  { %2382 = vmatpush.bf16.msrb.mxu0 %v2235_v42  ;;  %v4218_v39 = vunpack.c.l.b16 %v1863_v23  ;;  %v4272_v23 = vunpack.c.l.b16 %v1870_v31  ;;  %v965_v31 = vrot.slane %v2724_v32, 7 }
 0x2a4   :  { %v2239_v55 = vpack.c.b16 %v4218_v39, %v4216_v30 }
 0x2a6   :  { %2383 = vmatpush.bf16.msrb.mxu0 %v2234_v50 }
 0x2a9   :  { %835 = vperm.xlu2 %2707, %v4936_v37   ;;  %829 = vperm.xlu1 %2706, %v4936_v37   ;;  %v4229_v56 = vpop.permute.xlu2 %714 }
 0x2aa   :  { %2384 = vmatpush.bf16.msrb.mxu0 %v2233_v45  ;;  %v4962_v45 = vld [vmem:[#allocation39_spill] sm:$0xff] }
 0x2ab   :  { %v4238_v14 = vpop.permute.xlu1 %696  ;;  %vm1220_vm4 = vcmp.eq.f32.partialorder %v4962_v45, %v4279_v51  ;;  %vm1092_vm7 = vcmp.gt.f32.partialorder %v4962_v45, %v4279_v51 }
 0x2ae   :  { %2385 = vmatpush.bf16.msrb.mxu0 %v4957_v29  ;;  %v4963_v29 = vld [vmem:[#allocation43_spill] sm:$0xff] }
 0x2b1   :  { %932 = vperm.xlu2 %2707, %v4935_v49   ;;  %926 = vperm.xlu1 %2706, %v4935_v49  }
 0x2b2   :  { %2386 = vmatpush.bf16.msrb.mxu0 %v4958_v6 }
 0x2b3   :  { %v733_v42 = vpop.permute.xlu2 %732 }
 0x2b4   :  { %vm1200_vm1 = vcmp.eq.f32.partialorder %v733_v42, %v3418_v5 }
 0x2b9   :  { %2710 = vset.pattern.permute.xlu2 %v4864_v35  ;;  %2709 = vset.pattern.permute.xlu1 %v2908_v18  ;;  %v1875_v35 = vpack.c.bf16 %v2573_v53, %v2573_v53 }
 0x2bb   :  { %v4245_v9 = vpop.permute.xlu1 %708  ;;  %v4252_v8 = vunpack.c.l.b16 %v1875_v35 }
 0x2c1   :  { %914 = vperm.xlu2 %2710, %v4935_v49   ;;  %823 = vperm.xlu1 %2709, %v4936_v37  }
 0x2c3   :  { %v745_v36 = vpop.permute.xlu2 %744 }
 0x2c4   :  { %vm1074_vm3 = vcmp.gt.f32.partialorder %v745_v36, %v3418_v5  ;;  %vm1202_vm0 = vcmp.eq.f32.partialorder %v745_v36, %v3418_v5 }
 0x2c5   :  { %vm1362_vm10 = vmand %vm1202_vm0, %vm4942_vm2  ;;  %vm1072_vm0 = vcmp.gt.f32.partialorder %v733_v42, %v3418_v5  ;;  %vm1196_vm2 = vcmp.eq.f32.partialorder %v4245_v9, %v3418_v5 }
 0x2c6   :  { %vm1490_vm14 = vmor %vm1074_vm3, %vm1362_vm10  ;;  %vm4964_vm3 = vnez %v4963_v29  ;;  %vm4965_vm10 = vnez %v4735_v58 }
 0x2c7   :  { %v2572_v18 = vsel %vm1490_vm14, 1.0, %v4759_v25  ;;  %v2575_v6 = vsel %vm4964_vm3, 1.0, %v4759_v25  ;;  %vm1360_vm14 = vmand %vm1200_vm1, %vm4965_vm10 }
 0x2c8   :  { %v1874_v20 = vpack.c.bf16 %v2572_v18, %v2572_v18  ;;  %v1877_v35 = vpack.c.bf16 %v2575_v6, %v2575_v6 }
 0x2c9   :  { %2711 = vset.pattern.permute.xlu2 %v2875_v11  ;;  %920 = vperm.xlu1 %2709, %v4935_v49  }
 0x2ca   :  { %v4259_v17 = vunpack.c.l.b16 %v1874_v20  ;;  %v2166_v20 = vunpack.c.l.b16 %v1877_v35 }
 0x2cb   :  { %v727_v10 = vpop.permute.xlu1 %726 }
 0x2cc   :  { %v2245_v21 = vpack.c.b16 %v4252_v8, %v4259_v17  ;;  %vm1071_vm13 = vcmp.gt.f32.partialorder %v727_v10, %v3418_v5  ;;  %vm1199_vm15 = vcmp.eq.f32.partialorder %v727_v10, %v3418_v5 }
 0x2cd   :  { %vm1359_vm6 = vmand %vm1199_vm15, %vm4961_vm12  ;;  %vm4971_vm12 = vnez %v4908_v26 }
 0x2ce   :  { %vm1487_vm9 = vmor %vm1071_vm13, %vm1359_vm6 }
 0x2cf   :  { %v2569_v16 = vsel %vm1487_vm9, 1.0, %v4759_v25  ;;  %vm4296_vm13 = vmand %vm1220_vm4, %vm4966_vm11 }
 0x2d0   :  { %v1871_v57 = vpack.c.bf16 %v2569_v16, %v2569_v16  ;;  %vm4300_vm15 = vmor %vm1072_vm0, %vm1360_vm14  ;;  %vm1197_vm14 = vcmp.eq.f32.partialorder %v4229_v56, %v3418_v5 }
 0x2d1   :  { %805 = vperm.xlu2 %2711, %v4936_v37   ;;  %2713 = vset.pattern.permute.xlu1 %v2875_v11  ;;  %v2570_v16 = vsel %vm4300_vm15, 1.0, %v4759_v25  ;;  %vm4975_vm15 = vnez %v4766_v48 }
 0x2d2   :  { %v4277_v50 = vunpack.c.l.b16 %v1871_v57 }
 0x2d3   :  { %v4275_v52 = vpop.permute.xlu2 %950 }
 0x2d4   :  { %v2243_v59 = vpack.c.b16 %v4277_v50, %v4272_v23 }
 0x2d9   :  { %2714 = vset.pattern.permute.xlu2 %v2893_v15  ;;  %902 = vperm.xlu1 %2713, %v4935_v49  }
 0x2db   :  { %v757_v53 = vpop.permute.xlu2 %756  ;;  %v739_v42 = vpop.permute.xlu1 %738 }
 0x2dc   :  { %vm1076_vm6 = vcmp.gt.f32.partialorder %v757_v53, %v3418_v5  ;;  %vm1204_vm9 = vcmp.eq.f32.partialorder %v757_v53, %v3418_v5  ;;  %vm1073_vm3 = vcmp.gt.f32.partialorder %v739_v42, %v3418_v5  ;;  %vm1201_vm4 = vcmp.eq.f32.partialorder %v739_v42, %v3418_v5 }
 0x2dd   :  { %vm1364_vm1 = vmand %vm1204_vm9, %vm4966_vm11 }
 0x2de   :  { %vm1492_vm0 = vmor %vm1076_vm6, %vm1364_vm1  ;;  %vm1195_vm6 = vcmp.eq.f32.partialorder %v4222_v38, %v3418_v5  ;;  %vm1069_vm1 = vcmp.gt.f32.partialorder %v4229_v56, %v3418_v5 }
 0x2df   :  { %v2574_v15 = vsel %vm1492_vm0, 1.0, %v4759_v25  ;;  %vm1361_vm10 = vmand %vm1201_vm4, %vm4971_vm12  ;;  %vm1194_vm0 = vcmp.eq.f32.partialorder %v4238_v14, %v3418_v5 }
 0x2e0   :  { %vm1489_vm9 = vmor %vm1073_vm3, %vm1361_vm10  ;;  %v1876_v18 = vpack.c.bf16 %v2574_v15, %v2574_v15  ;;  %vm4974_vm10 = vnez %v4827_v27 }
 0x2e1   :  { %vm4321_vm11 = vmor %vm1092_vm7, %vm4296_vm13  ;;  %v2571_v10 = vsel %vm1489_vm9, 1.0, %v4759_v25  ;;  %908 = vperm.xlu2 %2714, %v4935_v49   ;;  %2715 = vset.pattern.permute.xlu1 %v4926_v4  ;;  %vm1068_vm7 = vcmp.gt.f32.partialorder %v4245_v9, %v3418_v5  ;;  %v4345_v4 = vperm.slane %v965_v31, 0  ;;  %vm1067_vm9 = vcmp.gt.f32.partialorder %v4222_v38, %v3418_v5 }
 0x2e2   :  { %vm1357_vm3 = vmand %vm1197_vm14, %vm4974_vm10  ;;  %v2165_v13 = vunpack.c.l.b16 %v1876_v18  ;;  %v1873_v32 = vpack.c.bf16 %v2571_v10, %v2571_v10  ;;  %v1872_v9 = vpack.c.bf16 %v2570_v16, %v2570_v16  ;;  %v2590_v38 = vsel %vm4321_vm11, 1.0, %v4759_v25 }
 0x2e3   :  { %vm1356_vm13 = vmand %vm1196_vm2, %vm4953_vm8  ;;  %vm1066_vm2 = vcmp.gt.f32.partialorder %v4238_v14, %v3418_v5  ;;  %vm4976_vm11 = vnez %v4745_v0  ;;  %v1892_v35 = vpack.c.bf16 %v2590_v38, %v2590_v38 }
 0x2e4   :  { %vm1355_vm4 = vmand %vm1195_vm6, %vm4954_vm5  ;;  %v2246_v56 = vpack.c.b16 %v2166_v20, %v2165_v13  ;;  %v2162_v57 = vunpack.c.l.b16 %v1873_v32  ;;  %v2161_v5 = vunpack.c.l.b16 %v1872_v9 }
 0x2e5   :  { %vm1485_vm14 = vmor %vm1069_vm1, %vm1357_vm3  ;;  %vm1236_vm3 = vcmp.eq.f32.partialorder %v4275_v52, %v4345_v4  ;;  %v2181_v20 = vunpack.c.l.b16 %v1892_v35 }
 0x2e6   :  { %vm1484_vm10 = vmor %vm1068_vm7, %vm1356_vm13  ;;  %2392 = vmatpush.bf16.msrb.mxu1 %v2246_v56  ;;  %v2567_v45 = vsel %vm1485_vm14, 1.0, %v4759_v25  ;;  %v2244_v11 = vpack.c.b16 %v2162_v57, %v2161_v5 }
 0x2e7   :  { %vm1354_vm6 = vmand %vm1194_vm0, %vm4975_vm15  ;;  %v2566_v29 = vsel %vm1484_vm10, 1.0, %v4759_v25  ;;  %v1869_v36 = vpack.c.bf16 %v2567_v45, %v2567_v45  ;;  %vm4977_vm0 = vnez %v4741_v41  ;;  %v4979_v45 = vpack.c.b16 %v4125_v46, %v4138_v62 }
 0x2e8   :  { %vm1483_vm5 = vmor %vm1067_vm9, %vm1355_vm4  ;;  %v1868_v53 = vpack.c.bf16 %v2566_v29, %v2566_v29  ;;  %vm1108_vm4 = vcmp.gt.f32.partialorder %v4275_v52, %v4345_v4 }
 0x2e9   :  { %2716 = vset.pattern.permute.xlu2 %v4898_v63  ;;  %vm1482_vm1 = vmor %vm1066_vm2, %vm1354_vm6  ;;  %793 = vperm.xlu1 %2715, %v4936_v37   ;;  %v2565_v14 = vsel %vm1483_vm5, 1.0, %v4759_v25  ;;  %v2158_v15 = vunpack.c.l.b16 %v1869_v36 }
 0x2ea   :  { %2393 = vmatpush.bf16.msrb.mxu1 %v2245_v21  ;;  %v2564_v42 = vsel %vm1482_vm1, 1.0, %v4759_v25  ;;  %vm1396_vm10 = vmand %vm1236_vm3, %vm4976_vm11  ;;  %v1867_v8 = vpack.c.bf16 %v2565_v14, %v2565_v14  ;;  %v2157_v21 = vunpack.c.l.b16 %v1868_v53 }
 0x2eb   :  { %v860_v6 = vpop.permute.xlu1 %859  ;;  %v1866_v0 = vpack.c.bf16 %v2564_v42, %v2564_v42  ;;  %vm1524_vm9 = vmor %vm1108_vm4, %vm1396_vm10  ;;  %v848_v32 = vpop.permute.xlu2 %847 }
 0x2ec   :  { %vm1093_vm7 = vcmp.gt.f32.partialorder %v860_v6, %v4279_v51  ;;  %vm1221_vm13 = vcmp.eq.f32.partialorder %v860_v6, %v4279_v51  ;;  %v2606_v28 = vsel %vm1524_vm9, 1.0, %v4759_v25  ;;  %v2242_v31 = vpack.c.b16 %v2158_v15, %v2157_v21 }
 0x2ed   :  { %vm1381_vm5 = vmand %vm1221_vm13, %vm4977_vm0  ;;  %v2155_v13 = vunpack.c.l.b16 %v1866_v0  ;;  %v2156_v16 = vunpack.c.l.b16 %v1867_v8  ;;  %vm1219_vm11 = vcmp.eq.f32.partialorder %v848_v32, %v4279_v51  ;;  %vm1091_vm10 = vcmp.gt.f32.partialorder %v848_v32, %v4279_v51 }
 0x2ee   :  { %2394 = vmatpush.bf16.msrb.mxu1 %v2244_v11  ;;  %vm1509_vm14 = vmor %vm1093_vm7, %vm1381_vm5  ;;  %vm4978_vm7 = vnez %v4801_v19 }
 0x2ef   :  { %v2591_v17 = vsel %vm1509_vm14, 1.0, %v4759_v25  ;;  %v2241_v50 = vpack.c.b16 %v2156_v16, %v2155_v13  ;;  %vm1379_vm13 = vmand %vm1219_vm11, %vm4978_vm7 }
 0x2f0   :  { %v1893_v18 = vpack.c.bf16 %v2591_v17, %v2591_v17  ;;  %vm1507_vm4 = vmor %vm1091_vm10, %vm1379_vm13 }
 0x2f1   :  { %799 = vperm.xlu2 %2716, %v4936_v37   ;;  %2718 = vset.pattern.permute.xlu1 %v4898_v63  ;;  %v1908_v63 = vpack.c.bf16 %v2606_v28, %v2606_v28 }
 0x2f2   :  { %2395 = vmatpush.bf16.msrb.mxu1 %v2243_v59  ;;  %v2182_v52 = vunpack.c.l.b16 %v1893_v18 }
 0x2f3   :  { %v957_v10 = vpop.permute.xlu1 %956  ;;  %v2197_v9 = vunpack.c.l.b16 %v1908_v63  ;;  %v945_v29 = vpop.permute.xlu2 %944 }
 0x2f4   :  { %vm1109_vm2 = vcmp.gt.f32.partialorder %v957_v10, %v4345_v4  ;;  %vm1237_vm6 = vcmp.eq.f32.partialorder %v957_v10, %v4345_v4  ;;  %v2254_v56 = vpack.c.b16 %v2182_v52, %v2181_v20 }
 0x2f5   :  { %vm1397_vm1 = vmand %vm1237_vm6, %vm4977_vm0  ;;  %vm1235_vm0 = vcmp.eq.f32.partialorder %v945_v29, %v4345_v4  ;;  %vm4980_vm6 = vnez %v4782_v12 }
 0x2f6   :  { %2396 = vmatpush.bf16.msrb.mxu1 %v2242_v31  ;;  %vm1525_vm3 = vmor %vm1109_vm2, %vm1397_vm1  ;;  %2405 = vmatpush.bf16.msrb.mxu2 %v2254_v56  ;;  %vm1107_vm2 = vcmp.gt.f32.partialorder %v945_v29, %v4345_v4 }
 0x2f7   :  { %v2607_v23 = vsel %vm1525_vm3, 1.0, %v4759_v25  ;;  %vm1395_vm5 = vmand %vm1235_vm0, %vm4978_vm7 }
 0x2f8   :  { %v1909_v59 = vpack.c.bf16 %v2607_v23, %v2607_v23  ;;  %vm1523_vm11 = vmor %vm1107_vm2, %vm1395_vm5 }
 0x2f9   :  { %2719 = vset.pattern.permute.xlu2 %v4889_v33  ;;  %896 = vperm.xlu1 %2718, %v4935_v49   ;;  %v2589_v33 = vsel %vm1507_vm4, 1.0, %v4759_v25  ;;  %v2605_v39 = vsel %vm1523_vm11, 1.0, %v4759_v25 }
 0x2fa   :  { %2397 = vmatpush.bf16.msrb.mxu1 %v2241_v50  ;;  %v2198_v57 = vunpack.c.l.b16 %v1909_v59  ;;  %v1891_v46 = vpack.c.bf16 %v2589_v33, %v2589_v33  ;;  %v1907_v6 = vpack.c.bf16 %v2605_v39, %v2605_v39 }
 0x2fc   :  { %v2262_v41 = vpack.c.b16 %v2198_v57, %v2197_v9  ;;  %v2180_v30 = vunpack.c.l.b16 %v1891_v46  ;;  %v2196_v42 = vunpack.c.l.b16 %v1907_v6 }
 0x2fe   :  { %2398 = vmatpush.bf16.msrb.mxu1 %v4979_v45  ;;  %2418 = vmatpush.bf16.msrb.mxu3 %v2262_v41 }
 0x301   :  { %781 = vperm.xlu2 %2719, %v4936_v37   ;;  %2720 = vset.pattern.permute.xlu1 %v2843_v2 }
 0x302   :  { %2399 = vmatpush.bf16.msrb.mxu1 %v2239_v55 }
 0x303   :  { %v842_v38 = vpop.permute.xlu1 %841  ;;  %v836_v14 = vpop.permute.xlu2 %835 }
 0x304   :  { %vm1090_vm14 = vcmp.gt.f32.partialorder %v842_v38, %v4279_v51  ;;  %vm1218_vm9 = vcmp.eq.f32.partialorder %v842_v38, %v4279_v51  ;;  %vm1217_vm0 = vcmp.eq.f32.partialorder %v836_v14, %v4279_v51  ;;  %vm1089_vm5 = vcmp.gt.f32.partialorder %v836_v14, %v4279_v51 }
 0x305   :  { %vm1378_vm1 = vmand %vm1218_vm9, %vm4980_vm6 }
 0x306   :  { %vm1506_vm3 = vmor %vm1090_vm14, %vm1378_vm1 }
 0x307   :  { %v2588_v2 = vsel %vm1506_vm3, 1.0, %v4759_v25  ;;  %vm1377_vm14 = vmand %vm1217_vm0, %vm4971_vm12 }
 0x308   :  { %v1890_v62 = vpack.c.bf16 %v2588_v2, %v2588_v2  ;;  %vm1505_vm9 = vmor %vm1089_vm5, %vm1377_vm14 }
 0x309   :  { %878 = vperm.xlu2 %2719, %v4935_v49   ;;  %787 = vperm.xlu1 %2720, %v4936_v37   ;;  %v2587_v8 = vsel %vm1505_vm9, 1.0, %v4759_v25  ;;  %vm1214_vm9 = vcmp.eq.f32.partialorder %v3725_v43, %v4279_v51 }
 0x30a   :  { %v2179_v19 = vunpack.c.l.b16 %v1890_v62  ;;  %v1889_v17 = vpack.c.bf16 %v2587_v8, %v2587_v8 }
 0x30b   :  { %v939_v55 = vpop.permute.xlu1 %938  ;;  %v933_v35 = vpop.permute.xlu2 %932 }
 0x30c   :  { %vm1106_vm10 = vcmp.gt.f32.partialorder %v939_v55, %v4345_v4  ;;  %vm1234_vm7 = vcmp.eq.f32.partialorder %v939_v55, %v4345_v4  ;;  %v2253_v5 = vpack.c.b16 %v2180_v30, %v2179_v19  ;;  %vm1233_vm2 = vcmp.eq.f32.partialorder %v933_v35, %v4345_v4 }
 0x30d   :  { %vm1394_vm13 = vmand %vm1234_vm7, %vm4980_vm6  ;;  %vm1105_vm11 = vcmp.gt.f32.partialorder %v933_v35, %v4345_v4  ;;  %v2178_v15 = vunpack.c.l.b16 %v1889_v17  ;;  %v885_v17 = vpop.permute.xlu0 %884 }
 0x30e   :  { %vm1522_vm4 = vmor %vm1106_vm10, %vm1394_vm13  ;;  %2406 = vmatpush.bf16.msrb.mxu2 %v2253_v5  ;;  %vm4981_vm10 = vnez %v4735_v58 }
 0x30f   :  { %v2604_v11 = vsel %vm1522_vm4, 1.0, %v4759_v25  ;;  %vm1393_vm6 = vmand %vm1233_vm2, %vm4971_vm12  ;;  %vm1213_vm2 = vcmp.eq.f32.partialorder %v4067_v60, %v4279_v51 }
 0x310   :  { %v1906_v53 = vpack.c.bf16 %v2604_v11, %v2604_v11  ;;  %vm1521_vm4 = vmor %vm1105_vm11, %vm1393_vm6  ;;  %vm1086_vm6 = vcmp.gt.f32.partialorder %v3725_v43, %v4279_v51 }
 0x311   :  { %2722 = vset.pattern.permute.xlu2 %v2846_v3  ;;  %2721 = vset.pattern.permute.xlu1 %v4878_v22  ;;  %v2603_v18 = vsel %vm1521_vm4, 1.0, %v4759_v25 }
 0x312   :  { %v2195_v36 = vunpack.c.l.b16 %v1906_v53  ;;  %v1905_v28 = vpack.c.bf16 %v2603_v18, %v2603_v18 }
 0x314   :  { %v2261_v12 = vpack.c.b16 %v2196_v42, %v2195_v36  ;;  %v2194_v13 = vunpack.c.l.b16 %v1905_v28 }
 0x316   :  { %2419 = vmatpush.bf16.msrb.mxu3 %v2261_v12 }
 0x319   :  { %775 = vperm.xlu2 %2722, %v4936_v37   ;;  %769 = vperm.xlu1 %2721, %v4936_v37  }
 0x31b   :  { %v830_v3 = vpop.permute.xlu1 %829  ;;  %v915_v0 = vpop.permute.xlu2 %914 }
 0x31c   :  { %vm1088_vm1 = vcmp.gt.f32.partialorder %v830_v3, %v4279_v51  ;;  %vm1216_vm3 = vcmp.eq.f32.partialorder %v830_v3, %v4279_v51 }
 0x31d   :  { %vm1376_vm7 = vmand %vm1216_vm3, %vm4981_vm10 }
 0x31e   :  { %vm1504_vm13 = vmor %vm1088_vm1, %vm1376_vm7  ;;  %vm4982_vm1 = vnez %v4725_v44  ;;  %vm4983_vm7 = vnez %v4827_v27 }
 0x31f   :  { %v2586_v21 = vsel %vm1504_vm13, 1.0, %v4759_v25  ;;  %vm1374_vm3 = vmand %vm1214_vm9, %vm4982_vm1  ;;  %vm1230_vm9 = vcmp.eq.f32.partialorder %v915_v0, %v4345_v4 }
 0x320   :  { %v1888_v37 = vpack.c.bf16 %v2586_v21, %v2586_v21  ;;  %vm1373_vm13 = vmand %vm1213_vm2, %vm4983_vm7  ;;  %v73_v21 = vadd.s32 1, %v4878_v22 }
 0x321   :  { %872 = vperm.xlu2 %2722, %v4935_v49   ;;  %866 = vperm.xlu1 %2721, %v4935_v49   ;;  %vm1390_vm2 = vmand %vm1230_vm9, %vm4982_vm1 }
 0x322   :  { %v2177_v26 = vunpack.c.l.b16 %v1888_v37  ;;  %v4513_v18 = vmul.u32 128, %v73_v21 }
 0x323   :  { %v927_v20 = vpop.permute.xlu1 %926 }
 0x324   :  { %vm1104_vm12 = vcmp.gt.f32.partialorder %v927_v20, %v4345_v4  ;;  %vm1232_vm0 = vcmp.eq.f32.partialorder %v927_v20, %v4345_v4  ;;  %v2252_v52 = vpack.c.b16 %v2178_v15, %v2177_v26  ;;  %v4987_v15 = vld [vmem:[#allocation23_spill] sm:$0xff] }
 0x325   :  { %vm1392_vm5 = vmand %vm1232_vm0, %vm4981_vm10  ;;  %vm1085_vm10 = vcmp.gt.f32.partialorder %v4067_v60, %v4279_v51  ;;  %v57_v26 = vadd.s32 128, %v4987_v15  ;;  %v59_v28 = vadd.s32 384, %v4987_v15  ;;  %v62_v21 = vadd.s32 768, %v4987_v15 }
 0x326   :  { %vm1520_vm14 = vmor %vm1104_vm12, %vm1392_vm5  ;;  %2407 = vmatpush.bf16.msrb.mxu2 %v2252_v52  ;;  %v58_v52 = vadd.s32 256, %v4987_v15 }
 0x327   :  { %v2602_v10 = vsel %vm1520_vm14, 1.0, %v4759_v25  ;;  %vm1502_vm0 = vmor %vm1086_vm6, %vm1374_vm3  ;;  %vm1102_vm6 = vcmp.gt.f32.partialorder %v915_v0, %v4345_v4  ;;  %vm4984_vm3 = vnez %v4728_v47  ;;  %v4511_v0 = vmul.u32 128, %v4878_v22 }
 0x328   :  { %v1904_v49 = vpack.c.bf16 %v2602_v10, %v2602_v10  ;;  %vm1501_vm5 = vmor %vm1085_vm10, %vm1373_vm13  ;;  %v2584_v43 = vsel %vm1502_vm0, 1.0, %v4759_v25 }
 0x329   :  { %v2583_v56 = vsel %vm1501_vm5, 1.0, %v4759_v25  ;;  %v1886_v63 = vpack.c.bf16 %v2584_v43, %v2584_v43 }
 0x32a   :  { %v2193_v31 = vunpack.c.l.b16 %v1904_v49  ;;  %v1885_v50 = vpack.c.bf16 %v2583_v56, %v2583_v56 }
 0x32b   :  { %v806_v16 = vpop.permute.xlu2 %805  ;;  %v2175_v57 = vunpack.c.l.b16 %v1886_v63 }
 0x32c   :  { %vm1212_vm11 = vcmp.eq.f32.partialorder %v806_v16, %v4279_v51  ;;  %v2260_v58 = vpack.c.b16 %v2194_v13, %v2193_v31  ;;  %vm1084_vm4 = vcmp.gt.f32.partialorder %v806_v16, %v4279_v51  ;;  %v2174_v45 = vunpack.c.l.b16 %v1885_v50 }
 0x32d   :  { %vm1372_vm12 = vmand %vm1212_vm11, %vm4953_vm8 }
 0x32e   :  { %2420 = vmatpush.bf16.msrb.mxu3 %v2260_v58  ;;  %vm1500_vm14 = vmor %vm1084_vm4, %vm1372_vm12 }
 0x32f   :  { %v2582_v32 = vsel %vm1500_vm14, 1.0, %v4759_v25  ;;  %vm1518_vm4 = vmor %vm1102_vm6, %vm1390_vm2 }
 0x330   :  { %v1884_v23 = vpack.c.bf16 %v2582_v32, %v2582_v32  ;;  %v2600_v29 = vsel %vm1518_vm4, 1.0, %v4759_v25  ;;  %vm4985_vm4 = vnez %v4758_v1 }
 0x331   :  { %v1902_v2 = vpack.c.bf16 %v2600_v29, %v2600_v29 }
 0x332   :  { %v2173_v41 = vunpack.c.l.b16 %v1884_v23 }
 0x333   :  { %v824_v60 = vpop.permute.xlu1 %823  ;;  %v2191_v39 = vunpack.c.l.b16 %v1902_v2 }
 0x334   :  { %vm1087_vm15 = vcmp.gt.f32.partialorder %v824_v60, %v4279_v51  ;;  %vm1215_vm11 = vcmp.eq.f32.partialorder %v824_v60, %v4279_v51  ;;  %v2250_v62 = vpack.c.b16 %v2174_v45, %v2173_v41 }
 0x335   :  { %vm1375_vm10 = vmand %vm1215_vm11, %vm4984_vm3 }
 0x336   :  { %vm1503_vm13 = vmor %vm1087_vm15, %vm1375_vm10 }
 0x337   :  { %v2585_v59 = vsel %vm1503_vm13, 1.0, %v4759_v25 }
 0x338   :  { %v1887_v9 = vpack.c.bf16 %v2585_v59, %v2585_v59 }
 0x33a   :  { %v2176_v44 = vunpack.c.l.b16 %v1887_v9 }
 0x33b   :  { %v921_v33 = vpop.permute.xlu1 %920  ;;  %v909_v46 = vpop.permute.xlu2 %908 }
 0x33c   :  { %vm1103_vm1 = vcmp.gt.f32.partialorder %v921_v33, %v4345_v4  ;;  %vm1231_vm12 = vcmp.eq.f32.partialorder %v921_v33, %v4345_v4  ;;  %v2251_v38 = vpack.c.b16 %v2176_v44, %v2175_v57  ;;  %vm1229_vm5 = vcmp.eq.f32.partialorder %v909_v46, %v4345_v4 }
 0x33d   :  { %vm1391_vm15 = vmand %vm1231_vm12, %vm4984_vm3  ;;  %vm1101_vm14 = vcmp.gt.f32.partialorder %v909_v46, %v4345_v4 }
 0x33e   :  { %vm1519_vm0 = vmor %vm1103_vm1, %vm1391_vm15  ;;  %2408 = vmatpush.bf16.msrb.mxu2 %v2251_v38  ;;  %vm4986_vm15 = vnez %v4766_v48 }
 0x33f   :  { %v2601_v30 = vsel %vm1519_vm0, 1.0, %v4759_v25  ;;  %vm1389_vm9 = vmand %vm1229_vm5, %vm4983_vm7 }
 0x340   :  { %v1903_v19 = vpack.c.bf16 %v2601_v30, %v2601_v30  ;;  %vm1517_vm2 = vmor %vm1101_vm14, %vm1389_vm9  ;;  %vm1098_vm9 = vcmp.gt.f32.partialorder %v4081_v24, %v4345_v4  ;;  %v60_v30 = vadd.s32 512, %v4987_v15 }
 0x341   :  { %v2599_v5 = vsel %vm1517_vm2, 1.0, %v4759_v25 }
 0x342   :  { %v2192_v55 = vunpack.c.l.b16 %v1903_v19  ;;  %2409 = vmatpush.bf16.msrb.mxu2 %v2250_v62  ;;  %v1901_v6 = vpack.c.bf16 %v2599_v5, %v2599_v5  ;;  %v61_v19 = vadd.s32 640, %v4987_v15 }
 0x344   :  { %v2259_v47 = vpack.c.b16 %v2192_v55, %v2191_v39  ;;  %v2190_v36 = vunpack.c.l.b16 %v1901_v6 }
 0x346   :  { %2421 = vmatpush.bf16.msrb.mxu3 %v2259_v47 }
 0x34b   :  { %v903_v14 = vpop.permute.xlu1 %902  ;;  %v800_v11 = vpop.permute.xlu2 %799 }
 0x34c   :  { %vm1100_vm11 = vcmp.gt.f32.partialorder %v903_v14, %v4345_v4  ;;  %vm1228_vm6 = vcmp.eq.f32.partialorder %v903_v14, %v4345_v4  ;;  %vm1211_vm7 = vcmp.eq.f32.partialorder %v800_v11, %v4279_v51  ;;  %vm1083_vm13 = vcmp.gt.f32.partialorder %v800_v11, %v4279_v51 }
 0x34d   :  { %vm1388_vm3 = vmand %vm1228_vm6, %vm4953_vm8  ;;  %vm1226_vm8 = vcmp.eq.f32.partialorder %v4081_v24, %v4345_v4 }
 0x34e   :  { %vm1516_vm10 = vmor %vm1100_vm11, %vm1388_vm3  ;;  %vm1225_vm11 = vcmp.eq.f32.partialorder %v885_v17, %v4345_v4 }
 0x34f   :  { %v2598_v53 = vsel %vm1516_vm10, 1.0, %v4759_v25  ;;  %vm1371_vm1 = vmand %vm1211_vm7, %vm4985_vm4  ;;  %vm1097_vm10 = vcmp.gt.f32.partialorder %v885_v17, %v4345_v4  ;;  %vm4990_vm7 = vnez %v4756_v61 }
 0x350   :  { %v1900_v27 = vpack.c.bf16 %v2598_v53, %v2598_v53  ;;  %vm1499_vm12 = vmor %vm1083_vm13, %vm1371_vm1  ;;  %vm65_vm1 = vcmp.ge.s32.totalorder %v4987_v15, %v4511_v0 }
 0x351   :  { %v2581_v54 = vsel %vm1499_vm12, 1.0, %v4759_v25  ;;  %vm1386_vm0 = vmand %vm1226_vm8, %vm4986_vm15  ;;  %vm66_vm12 = vcmp.ge.s32.totalorder %v57_v26, %v4511_v0  ;;  %vm75_vm8 = vcmp.lt.s32.totalorder %v4987_v15, %v4513_v18 }
 0x352   :  { %v2189_v42 = vunpack.c.l.b16 %v1900_v27  ;;  %v1883_v3 = vpack.c.bf16 %v2581_v54, %v2581_v54  ;;  %vm4515_vm3 = vmor %vm1098_vm9, %vm1386_vm0  ;;  %vm67_vm9 = vcmp.ge.s32.totalorder %v58_v52, %v4511_v0 }
 0x353   :  { %vm1385_vm13 = vmand %vm1225_vm11, %vm4990_vm7  ;;  %v2596_v63 = vsel %vm4515_vm3, 1.0, %v4759_v25 }
 0x354   :  { %v2258_v12 = vpack.c.b16 %v2190_v36, %v2189_v42  ;;  %v2172_v20 = vunpack.c.l.b16 %v1883_v3  ;;  %vm83_vm0 = vmand %vm65_vm1, %vm75_vm8  ;;  %vm78_vm1 = vcmp.lt.s32.totalorder %v59_v28, %v4513_v18  ;;  %v1898_v29 = vpack.c.bf16 %v2596_v63, %v2596_v63 }
 0x355   :  { %v2471_v49 = vsel %vm83_vm0, 1.0, %v4759_v25  ;;  %vm4534_vm11 = vmor %vm1097_vm10, %vm1385_vm13 }
 0x356   :  { %2422 = vmatpush.bf16.msrb.mxu3 %v2258_v12  ;;  %v2595_v9 = vsel %vm4534_vm11, 1.0, %v4759_v25  ;;  %v2187_v55 = vunpack.c.l.b16 %v1898_v29  ;;  %vm70_vm11 = vcmp.ge.s32.totalorder %v61_v19, %v4511_v0 }
 0x357   :  { %v1897_v2 = vpack.c.bf16 %v2595_v9, %v2595_v9 }
 0x359   :  { %v2186_v5 = vunpack.c.l.b16 %v1897_v2 }
 0x35b   :  { %v4496_v35 = vpop.permute.xlu2 %781  ;;  %v794_v8 = vpop.permute.xlu1 %793 }
 0x35c   :  { %vm1082_vm5 = vcmp.gt.f32.partialorder %v794_v8, %v4279_v51  ;;  %vm1210_vm14 = vcmp.eq.f32.partialorder %v794_v8, %v4279_v51 }
 0x35d   :  { %vm1370_vm2 = vmand %vm1210_vm14, %vm4986_vm15  ;;  %vm76_vm15 = vcmp.lt.s32.totalorder %v57_v26, %v4513_v18  ;;  %v63_v26 = vadd.s32 896, %v4987_v15 }
 0x35e   :  { %vm1498_vm6 = vmor %vm1082_vm5, %vm1370_vm2  ;;  %vm68_vm2 = vcmp.ge.s32.totalorder %v59_v28, %v4511_v0 }
 0x35f   :  { %v2580_v37 = vsel %vm1498_vm6, 1.0, %v4759_v25  ;;  %vm84_vm14 = vmand %vm66_vm12, %vm76_vm15  ;;  %vm77_vm6 = vcmp.lt.s32.totalorder %v58_v52, %v4513_v18  ;;  %vm4993_vm12 = vnez %v4750_v7 }
 0x360   :  { %v1882_v48 = vpack.c.bf16 %v2580_v37, %v2580_v37  ;;  %v2472_v16 = vsel %vm84_vm14, 1.0, %v4759_v25  ;;  %vm85_vm0 = vmand %vm67_vm9, %vm77_vm6  ;;  %vm80_vm6 = vcmp.lt.s32.totalorder %v61_v19, %v4513_v18 }
 0x361   :  { %v107_v58 = vpack.c.bf16 %v2472_v16, %v2471_v49  ;;  %vm86_vm10 = vmand %vm68_vm2, %vm78_vm1  ;;  %v2473_v56 = vsel %vm85_vm0, 1.0, %v4759_v25  ;;  %vm69_vm2 = vcmp.ge.s32.totalorder %v60_v30, %v4511_v0  ;;  %vm1208_vm1 = vcmp.eq.f32.partialorder %v4496_v35, %v4279_v51 }
 0x362   :  { %v2171_v22 = vunpack.c.l.b16 %v1882_v48  ;;  %v2474_v32 = vsel %vm86_vm10, 1.0, %v4759_v25  ;;  %vm1080_vm0 = vcmp.gt.f32.partialorder %v4496_v35, %v4279_v51  ;;  %vm1368_vm10 = vmand %vm1208_vm1, %vm4993_vm12  ;;  %vm72_vm1 = vcmp.ge.s32.totalorder %v63_v26, %v4511_v0 }
 0x363   :  { %v879_v10 = vpop.permute.xlu2 %878  ;;  %v1919_v43 = vunpack.c.l.b16 %v107_v58  ;;  %v1920_v60 = vunpack.c.h.b16 %v107_v58  ;;  %v108_v50 = vpack.c.bf16 %v2474_v32, %v2473_v56 }
 0x364   :  { %vm1224_vm5 = vcmp.eq.f32.partialorder %v879_v10, %v4345_v4  ;;  %v2249_v13 = vpack.c.b16 %v2172_v20, %v2171_v22  ;;  %vm1096_vm8 = vcmp.gt.f32.partialorder %v879_v10, %v4345_v4 }
 0x365   :  { %vm1384_vm15 = vmand %vm1224_vm5, %vm4993_vm12  ;;  %v1927_v23 = vpack.c.b16 %v1919_v43, %v1919_v43  ;;  %v1928_v59 = vpack.c.b16 %v1920_v60, %v1920_v60  ;;  %v1921_v41 = vunpack.c.l.b16 %v108_v50  ;;  %v1922_v45 = vunpack.c.h.b16 %v108_v50 }
 0x366   :  { %2410 = vmatpush.bf16.msrb.mxu2 %v2249_v13  ;;  %vm1512_vm13 = vmor %vm1096_vm8, %vm1384_vm15 }
 0x367   :  { %v2594_v44 = vsel %vm1512_vm13, 1.0, %v4759_v25  ;;  %2335 = vmatmul.bf16.vlgmr.msra.gmra.mxu0 %v1927_v23  ;;  %2348 = vmatmul.bf16.vlgmr.msra.gmra.mxu1 %v1928_v59  ;;  %v1929_v33 = vpack.c.b16 %v1921_v41, %v1921_v41  ;;  %v1930_v38 = vpack.c.b16 %v1922_v45, %v1922_v45  ;;  %vm88_vm15 = vmand %vm70_vm11, %vm80_vm6  ;;  %vm4994_vm11 = vnez %v4721_v40 }
 0x368   :  { %v1896_v46 = vpack.c.bf16 %v2594_v44, %v2594_v44  ;;  %v2476_v11 = vsel %vm88_vm15, 1.0, %v4759_v25  ;;  %vm1496_vm13 = vmor %vm1080_vm0, %vm1368_vm10  ;;  %vm81_vm6 = vcmp.lt.s32.totalorder %v62_v21, %v4513_v18 }
 0x369   :  { %2361 = vmatmul.bf16.vlgmr.msra.gmra.mxu2 %v1929_v33  ;;  %2374 = vmatmul.bf16.vlgmr.msra.gmra.mxu3 %v1930_v38  ;;  %v2578_v8 = vsel %vm1496_vm13, 1.0, %v4759_v25 }
 0x36a   :  { %v2185_v47 = vunpack.c.l.b16 %v1896_v46  ;;  %v1880_v7 = vpack.c.bf16 %v2578_v8, %v2578_v8 }
 0x36b   :  { %v897_v57 = vpop.permute.xlu1 %896 }
 0x36c   :  { %vm1099_vm5 = vcmp.gt.f32.partialorder %v897_v57, %v4345_v4  ;;  %vm1227_vm14 = vcmp.eq.f32.partialorder %v897_v57, %v4345_v4  ;;  %v2256_v27 = vpack.c.b16 %v2186_v5, %v2185_v47  ;;  %v2169_v24 = vunpack.c.l.b16 %v1880_v7  ;;  %v2448_v47 = vld [vmem:[#allocation8] sm:$0xff] }
 0x36d   :  { %vm1387_vm3 = vmand %vm1227_vm14, %vm4985_vm4  ;;  %vm79_vm4 = vcmp.lt.s32.totalorder %v60_v30, %v4513_v18 }
 0x36e   :  { %vm1515_vm9 = vmor %vm1099_vm5, %vm1387_vm3 }
 0x36f   :  { %v2597_v62 = vsel %vm1515_vm9, 1.0, %v4759_v25  ;;  %vm87_vm8 = vmand %vm69_vm2, %vm79_vm4 }
 0x370   :  { %v1899_v39 = vpack.c.bf16 %v2597_v62, %v2597_v62  ;;  %v2475_v14 = vsel %vm87_vm8, 1.0, %v4759_v25  ;;  %vm82_vm8 = vcmp.lt.s32.totalorder %v63_v26, %v4513_v18 }
 0x371   :  { %v109_v53 = vpack.c.bf16 %v2476_v11, %v2475_v14  ;;  %vm90_vm10 = vmand %vm72_vm1, %vm82_vm8 }
 0x372   :  { %v2188_v1 = vunpack.c.l.b16 %v1899_v39  ;;  %v2478_v28 = vsel %vm90_vm10, 1.0, %v4759_v25 }
 0x373   :  { %v1923_v36 = vunpack.c.l.b16 %v109_v53  ;;  %v1924_v42 = vunpack.c.h.b16 %v109_v53  ;;  %v776_v35 = vpop.permute.xlu2 %775  ;;  %v2445_v53 = vpop.permute.xlu0 %2444 }
 0x374   :  { %v2257_v6 = vpack.c.b16 %v2188_v1, %v2187_v55  ;;  %vm1207_vm9 = vcmp.eq.f32.partialorder %v776_v35, %v4279_v51  ;;  %vm1079_vm2 = vcmp.gt.f32.partialorder %v776_v35, %v4279_v51 }
 0x375   :  { %v1931_v12 = vpack.c.b16 %v1923_v36, %v1923_v36  ;;  %v1932_v54 = vpack.c.b16 %v1924_v42, %v1924_v42  ;;  %vm1367_vm4 = vmand %vm1207_vm9, %vm4994_vm11  ;;  %vm4995_vm9 = vnez %v4747_v34 }
 0x376   :  { %2423 = vmatpush.bf16.msrb.mxu3 %v2257_v6  ;;  %vm1495_vm15 = vmor %vm1079_vm2, %vm1367_vm4 }
 0x377   :  { %2387 = vmatmul.bf16.vlgmr.msrb.gmra.mxu0 %v1931_v12  ;;  %2400 = vmatmul.bf16.vlgmr.msrb.gmra.mxu1 %v1932_v54  ;;  %v2577_v15 = vsel %vm1495_vm15, 1.0, %v4759_v25  ;;  %vm2449_vm15 = vcmp.gt.s32.totalorder %v2448_v47, 0 }
 0x37a   :  { %2424 = vmatpush.bf16.msrb.mxu3 %v2256_v27  ;;  %v4996_v27 = vmov 0  }
 0x37b   :  { %v788_v3 = vpop.permute.xlu1 %787  ;;  %v873_v20 = vpop.permute.xlu2 %872 }
 0x37c   :  { %vm1081_vm5 = vcmp.gt.f32.partialorder %v788_v3, %v4279_v51  ;;  %vm1209_vm14 = vcmp.eq.f32.partialorder %v788_v3, %v4279_v51  ;;  %vm1223_vm13 = vcmp.eq.f32.partialorder %v873_v20, %v4345_v4 }
 0x37d   :  { %vm1369_vm12 = vmand %vm1209_vm14, %vm4990_vm7  ;;  %vm71_vm7 = vcmp.ge.s32.totalorder %v62_v21, %v4511_v0  ;;  %v1879_v0 = vpack.c.bf16 %v2577_v15, %v2577_v15 }
 0x37e   :  { %vm1497_vm3 = vmor %vm1081_vm5, %vm1369_vm12 }
 0x37f   :  { %v2579_v17 = vsel %vm1497_vm3, 1.0, %v4759_v25  ;;  %vm89_vm0 = vmand %vm71_vm7, %vm81_vm6  ;;  %vm1095_vm3 = vcmp.gt.f32.partialorder %v873_v20, %v4345_v4  ;;  %v2168_v31 = vunpack.c.l.b16 %v1879_v0 }
 0x380   :  { %v1881_v37 = vpack.c.bf16 %v2579_v17, %v2579_v17  ;;  %v2477_v52 = vsel %vm89_vm0, 1.0, %v4759_v25  ;;  %vm1383_vm5 = vmand %vm1223_vm13, %vm4994_vm11 }
 0x381   :  { %v110_v18 = vpack.c.bf16 %v2478_v28, %v2477_v52  ;;  %vm1511_vm7 = vmor %vm1095_vm3, %vm1383_vm5 }
 0x382   :  { %v2170_v48 = vunpack.c.l.b16 %v1881_v37  ;;  %v2593_v16 = vsel %vm1511_vm7, 1.0, %v4759_v25 }
 0x383   :  { %v1925_v13 = vunpack.c.l.b16 %v110_v18  ;;  %v1895_v56 = vpack.c.bf16 %v2593_v16, %v2593_v16  ;;  %v1926_v63 = vunpack.c.h.b16 %v110_v18 }
 0x384   :  { %v2248_v61 = vpack.c.b16 %v2170_v48, %v2169_v24 }
 0x385   :  { %v1933_v43 = vpack.c.b16 %v1925_v13, %v1925_v13  ;;  %v2184_v23 = vunpack.c.l.b16 %v1895_v56  ;;  %v1934_v9 = vpack.c.b16 %v1926_v63, %v1926_v63 }
 0x386   :  { %2411 = vmatpush.bf16.msrb.mxu2 %v2248_v61 }
 0x38b   :  { %v770_v22 = vpop.permute.xlu1 %769 }
 0x38c   :  { %vm1078_vm14 = vcmp.gt.f32.partialorder %v770_v22, %v4279_v51  ;;  %vm1206_vm12 = vcmp.eq.f32.partialorder %v770_v22, %v4279_v51 }
 0x38d   :  { %vm1366_vm2 = vmand %vm1206_vm12, %vm4995_vm9 }
 0x38e   :  { %vm1494_vm4 = vmor %vm1078_vm14, %vm1366_vm2 }
 0x38f   :  { %v2576_v10 = vsel %vm1494_vm4, 1.0, %v4759_v25 }
 0x390   :  { %v1878_v49 = vpack.c.bf16 %v2576_v10, %v2576_v10 }
 0x392   :  { %v2167_v40 = vunpack.c.l.b16 %v1878_v49 }
 0x393   :  { %v867_v58 = vpop.permute.xlu1 %866 }
 0x394   :  { %vm1094_vm11 = vcmp.gt.f32.partialorder %v867_v58, %v4345_v4  ;;  %vm1222_vm6 = vcmp.eq.f32.partialorder %v867_v58, %v4345_v4  ;;  %v2247_v51 = vpack.c.b16 %v2168_v31, %v2167_v40 }
 0x395   :  { %vm1382_vm1 = vmand %vm1222_vm6, %vm4995_vm9 }
 0x396   :  { %vm1510_vm8 = vmor %vm1094_vm11, %vm1382_vm1  ;;  %2412 = vmatpush.bf16.msrb.mxu2 %v2247_v51 }
 0x397   :  { %v2592_v60 = vsel %vm1510_vm8, 1.0, %v4759_v25 }
 0x398   :  { %v1894_v32 = vpack.c.bf16 %v2592_v60, %v2592_v60 }
 0x399   :  { %2413 = vmatmul.bf16.vlgmr.msrb.gmra.mxu2 %v1933_v43 }
 0x39a   :  { %v2183_v50 = vunpack.c.l.b16 %v1894_v32 }
 0x39c   :  { %v2255_v59 = vpack.c.b16 %v2184_v23, %v2183_v50 }
 0x39e   :  { %2425 = vmatpush.bf16.msrb.mxu3 %v2255_v59 }
 0x3a1   :  { %2426 = vmatmul.bf16.vlgmr.msrb.gmra.mxu3 %v1934_v9 }
 0x3e4   :  { %v2336_v4 = vpop.f32.mrf.mxu0  ;;  %v2349_v57 = vpop.f32.mrf.mxu1 }
 0x3e5   :  { %v2350_v62 = vadd.f32 %v2349_v57, %v2336_v4 }
 0x3ec   :  { %v2338_v44 = vpop.f32.mrf.mxu0  ;;  %v2351_v34 = vpop.f32.mrf.mxu1 }
 0x3ed   :  { %v2362_v41 = vpop.f32.mrf.mxu2  ;;  %v2375_v45 = vpop.f32.mrf.mxu3 }
 0x3ee   :  { %v2363_v30 = vadd.f32 %v2362_v41, %v2350_v62 }
 0x3f0   :  { %v2376_v19 = vadd.f32 %v2375_v45, %v2363_v30 }
 0x3f4   :  { %v2388_v29 = vpop.f32.mrf.mxu0  ;;  %v2401_v33 = vpop.f32.mrf.mxu1 }
 0x3f5   :  { %v2364_v38 = vpop.f32.mrf.mxu2  ;;  %v2377_v46 = vpop.f32.mrf.mxu3  ;;  %v2389_v55 = vadd.f32 %v2388_v29, %v2376_v19 }
 0x3f7   :  { %v2402_v1 = vadd.f32 %v2401_v33, %v2389_v55 }
 0x3fc   :  { %v2390_v25 = vpop.f32.mrf.mxu0  ;;  %v2403_v2 = vpop.f32.mrf.mxu1 }
 0x41c   :  { %v2414_v39 = vpop.f32.mrf.mxu2 }
 0x41d   :  { %v2415_v5 = vadd.f32 %v2414_v39, %v2402_v1 }
 0x424   :  { %v2416_v14 = vpop.f32.mrf.mxu2  ;;  %v2427_v6 = vpop.f32.mrf.mxu3 }
 0x425   :  { %v2428_v11 = vadd.f32 %v2427_v6, %v2415_v5 }
 0x427   :  { %vm2447_vm0 = vcmp.lt.f32.partialorder %v2428_v11, %v2445_v53 }
 0x428   :  { %vm2450_vm10 = vmand %vm2447_vm0, %vm2449_vm15 }
 0x429   :  { %v2451_v36 = vsel %vm2450_vm10, 1, %v4996_v27 }
 0x42a   :  { %2452 = vst [vmem:[#allocation10] sm:$0xff] %v2451_v36 }
 0x42b   :  { %2463 = dma.vmem_to_hbm [thread:$0]  %s2459_s28, 128, %s2461_s5, [#allocation7]  }
 0x42c   :  { %v2429_v42 = vpop.f32.mrf.mxu3 }
 0x42d   :  { %2801 = dma.done.wait [#allocation7], 128  }
 0x42e   :  { %2802 = vsyncadd [#allocation7], 4294967168 }
 0x42f   :  { %2468 = vsyncpa [#allocation6], 1 }
 0x430   :  { %2469 = vsyncpa [#allocation9], 1 }
 0x431   :  { %2470 = vsyncpa [#allocation7], 1 }

</bundles_post_ra>
